<compile_context>
chip_gen: v5e
topology: v5e:2x2
jax: 0.10.0
libtpu: 0.0.40
codegen_flags: <defaults>
</compile_context>

<pallas_src>
import functools

import jax
import jax.numpy as jnp
from jax.experimental import pallas as pl
from jax.experimental.pallas import tpu as pltpu

EPS = 1e-5            # nn.LayerNorm default
NEG_INF = -1e9        # finite additive mask value (avoids inf-inf NaNs)

_LINEAR_VMEM_LIMIT = 32 * 1024 * 1024   # ok on v5e/v6e/v7x
_ATTN_VMEM_LIMIT = 48 * 1024 * 1024     # < v7x physical 64 MiB


# ----------------------------------------------------------------------------
# Tile picker
# ----------------------------------------------------------------------------
def _tile(dim, target, align):
    """Largest block <= target that is a multiple of `align` and divides dim.

    Falls back to the full dimension when dim is small or has no aligned
    divisor (full-dim blocks are always legal)."""
    if dim <= target:
        return dim
    t = (target // align) * align
    while t >= align:
        if dim % t == 0:
            return t
        t -= align
    return dim


# ----------------------------------------------------------------------------
# Tiled linear kernels (bias + optional relu)
# ----------------------------------------------------------------------------
def _linear_acc_kernel(x_ref, w_ref, b_ref, o_ref, acc_ref, *, activation):
    """Scratch-accumulator variant (used for bf16 outputs)."""
    @pl.when(pl.program_id(2) == 0)
    def _():
        acc_ref[...] = jnp.zeros_like(acc_ref)

    acc_ref[...] += jnp.dot(x_ref[...].astype(jnp.bfloat16), w_ref[...],
                            preferred_element_type=jnp.float32)

    @pl.when(pl.program_id(2) == pl.num_programs(2) - 1)
    def _():
        y = acc_ref[...] + b_ref[...]
        if activation == "relu":
            y = jnp.maximum(y, 0.0)
        o_ref[...] = y.astype(o_ref.dtype)


def _linear_direct_kernel(x_ref, w_ref, b_ref, o_ref, *, activation):
    """f32 output: accumulate directly into the resident output block."""
    k = pl.program_id(2)
    part = jnp.dot(x_ref[...].astype(jnp.bfloat16), w_ref[...],
                   preferred_element_type=jnp.float32)

    @pl.when(k == 0)
    def _():
        o_ref[...] = part + b_ref[...]

    @pl.when(k > 0)
    def _():
        o_ref[...] = o_ref[...] + part

    if activation == "relu":
        @pl.when(k == pl.num_programs(2) - 1)
        def _():
            o_ref[...] = jnp.maximum(o_ref[...], 0.0)


def linear(x, w_bf16, b, activation=None, out_dtype=jnp.bfloat16,
           tm=256, tn=512, tk=512):
    """x: (M, K) (bf16 preferred); w_bf16: (K, N) bf16; b: (N,) f32."""
    M, K = x.shape
    _, N = w_bf16.shape
    tm = _tile(M, tm, 16)
    tn = _tile(N, tn, 128)
    tk = _tile(K, tk, 128)
    grid = (M // tm, N // tn, K // tk)

    # Small-M linears are weight-DMA bound: deepen the weight pipeline.
    if M <= 256 and grid[2] >= 3:
        w_spec = pl.BlockSpec((tk, tn), lambda i, j, k: (k, j),
                              pipeline_mode=pl.Buffered(3))
    else:
        w_spec = pl.BlockSpec((tk, tn), lambda i, j, k: (k, j))

    out_itemsize = jnp.dtype(out_dtype).itemsize
    cost = pl.CostEstimate(
        flops=2 * M * N * K,
        transcendentals=0,
        bytes_accessed=int(M * K * x.dtype.itemsize + K * N * 2
                           + M * N * out_itemsize + N * 4),
    )

    if jnp.dtype(out_dtype) == jnp.dtype(jnp.float32):
        kernel = functools.partial(_linear_direct_kernel, activation=activation)
        scratch = []
    else:
        kernel = functools.partial(_linear_acc_kernel, activation=activation)
        scratch = [pltpu.VMEM((tm, tn), jnp.float32)]

    return pl.pallas_call(
        kernel,
        out_shape=jax.ShapeDtypeStruct((M, N), out_dtype),
        grid=grid,
        in_specs=[
            pl.BlockSpec((tm, tk), lambda i, j, k: (i, k)),
            w_spec,
            pl.BlockSpec((1, tn), lambda i, j, k: (0, j)),
        ],
        out_specs=pl.BlockSpec((tm, tn), lambda i, j, k: (i, j)),
        scratch_shapes=scratch,
        compiler_params=pltpu.CompilerParams(
            dimension_semantics=("parallel", "parallel", "arbitrary"),
            vmem_limit_bytes=_LINEAR_VMEM_LIMIT),
        cost_estimate=cost,
    )(x, w_bf16, b.reshape(1, N))


# ----------------------------------------------------------------------------
# Tiled linear fused with (bias + residual-add + LayerNorm) epilogue
# ----------------------------------------------------------------------------
def _linear_res_ln_kernel(x_ref, w_ref, b_ref, res_ref, g_ref, bt_ref,
                          o_ref, acc_ref):
    @pl.when(pl.program_id(1) == 0)
    def _():
        acc_ref[...] = jnp.zeros_like(acc_ref)

    acc_ref[...] += jnp.dot(x_ref[...].astype(jnp.bfloat16), w_ref[...],
                            preferred_element_type=jnp.float32)

    @pl.when(pl.program_id(1) == pl.num_programs(1) - 1)
    def _():
        y = acc_ref[...] + b_ref[...] + res_ref[...].astype(jnp.float32)
        mean = jnp.mean(y, axis=-1, keepdims=True)
        c = y - mean
        var = jnp.mean(c * c, axis=-1, keepdims=True)
        o_ref[...] = (c * jax.lax.rsqrt(var + EPS) * g_ref[...]
                      + bt_ref[...]).astype(o_ref.dtype)


def linear_residual_ln(x, w_bf16, b, res, gamma, beta,
                       out_dtype=jnp.bfloat16, tm=256, tk=512):
    """LayerNorm(res + x @ w + b); full output dim kept per tile (LN row-wise)."""
    M, K = x.shape
    _, N = w_bf16.shape
    tm = _tile(M, tm, 16)
    tk = _tile(K, tk, 128)
    grid = (M // tm, K // tk)
    cost = pl.CostEstimate(
        flops=2 * M * N * K + 10 * M * N,
        transcendentals=0,
        bytes_accessed=int(M * K * x.dtype.itemsize + K * N * 2
                           + M * N * (res.dtype.itemsize
                                      + jnp.dtype(out_dtype).itemsize)
                           + 3 * N * 4),
    )
    return pl.pallas_call(
        _linear_res_ln_kernel,
        out_shape=jax.ShapeDtypeStruct((M, N), out_dtype),
        grid=grid,
        in_specs=[
            pl.BlockSpec((tm, tk), lambda i, k: (i, k)),
            pl.BlockSpec((tk, N), lambda i, k: (k, 0)),
            pl.BlockSpec((1, N), lambda i, k: (0, 0)),
            pl.BlockSpec((tm, N), lambda i, k: (i, 0)),
            pl.BlockSpec((1, N), lambda i, k: (0, 0)),
            pl.BlockSpec((1, N), lambda i, k: (0, 0)),
        ],
        out_specs=pl.BlockSpec((tm, N), lambda i, k: (i, 0)),
        scratch_shapes=[pltpu.VMEM((tm, N), jnp.float32)],
        compiler_params=pltpu.CompilerParams(
            dimension_semantics=("parallel", "arbitrary"),
            vmem_limit_bytes=_LINEAR_VMEM_LIMIT),
        cost_estimate=cost,
    )(x, w_bf16, b.reshape(1, N), res, gamma.reshape(1, N), beta.reshape(1, N))


# ----------------------------------------------------------------------------
# Flash self-attention kernel: grid (B, H, q_block, kv_block)
# ----------------------------------------------------------------------------
def _flash_self_attn_kernel(*refs, tq, tkv, causal, has_mask, has_kpm):
    q_ref, k_ref, v_ref = refs[:3]
    idx = 3
    mask_ref = refs[idx] if has_mask else None
    idx += 1 if has_mask else 0
    kpm_ref = refs[idx] if has_kpm else None
    idx += 1 if has_kpm else 0
    o_ref = refs[idx]
    m_sc, l_sc, acc_sc = refs[idx + 1:idx + 4]

    qi = pl.program_id(2)
    ki = pl.program_id(3)

    @pl.when(ki == 0)
    def _():
        m_sc[...] = jnp.full_like(m_sc, -jnp.inf)
        l_sc[...] = jnp.zeros_like(l_sc)
        acc_sc[...] = jnp.zeros_like(acc_sc)

    def block():
        # (tq, dh) x (tkv, dh) -> (tq, tkv)
        s = jax.lax.dot_general(q_ref[...], k_ref[...],
                                (((1,), (1,)), ((), ())),
                                preferred_element_type=jnp.float32)
        if causal:
            row = qi * tq + jax.lax.broadcasted_iota(jnp.int32, (tq, tkv), 0)
            col = ki * tkv + jax.lax.broadcasted_iota(jnp.int32, (tq, tkv), 1)
            s = jnp.where(col > row, NEG_INF, s)
        if has_mask:
            s = s + mask_ref[...]          # (tq, tkv) additive (finite) bias
        if has_kpm:
            s = s + kpm_ref[...]           # (1, tkv) key-padding bias
        m_prev = m_sc[...]
        m_new = jnp.maximum(m_prev, jnp.max(s, axis=-1, keepdims=True))
        alpha = jnp.exp(m_prev - m_new)
        p = jnp.exp(s - m_new)
        l_sc[...] = alpha * l_sc[...] + jnp.sum(p, axis=-1, keepdims=True)
        acc_sc[...] = alpha * acc_sc[...] + jax.lax.dot_general(
            p.astype(jnp.bfloat16), v_ref[...],
            (((1,), (0,)), ((), ())), preferred_element_type=jnp.float32)
        m_sc[...] = m_new

    if causal:
        # skip kv blocks that lie entirely above the causal diagonal
        pl.when(ki * tkv <= qi * tq + (tq - 1))(block)
    else:
        block()

    @pl.when(ki == pl.num_programs(3) - 1)
    def _():
        inv = pl.reciprocal(l_sc[...], approx=True)
        o_ref[...] = (acc_sc[...] * inv).astype(o_ref.dtype)


def flash_self_attention(qkv5, attn_mask, key_bias, *, causal,
                         out_dtype=jnp.bfloat16):
    """qkv5: (3, B, H, T, dh) bf16; attn_mask: (T, T) additive or None;
    key_bias: (B, 1, T) additive or None. Returns (B, H, T, dh)."""
    _, B, H, T, dh = qkv5.shape
    tq = _tile(T, 256, 8)
    tkv = _tile(T, 512, 128)
    nq, nk = T // tq, T // tkv
    has_mask = attn_mask is not None
    has_kpm = key_bias is not None

    in_specs = [
        pl.BlockSpec((None, None, None, tq, dh),
                     lambda b, h, qi, ki: (0, b, h, qi, 0)),
        pl.BlockSpec((None, None, None, tkv, dh),
                     lambda b, h, qi, ki: (1, b, h, ki, 0)),
        pl.BlockSpec((None, None, None, tkv, dh),
                     lambda b, h, qi, ki: (2, b, h, ki, 0)),
    ]
    operands = [qkv5, qkv5, qkv5]
    if has_mask:
        in_specs.append(pl.BlockSpec((tq, tkv), lambda b, h, qi, ki: (qi, ki)))
        operands.append(attn_mask.astype(jnp.float32))
    if has_kpm:
        in_specs.append(pl.BlockSpec((None, 1, tkv),
                                     lambda b, h, qi, ki: (b, 0, ki)))
        operands.append(key_bias)

    kernel = functools.partial(_flash_self_attn_kernel, tq=tq, tkv=tkv,
                               causal=causal, has_mask=has_mask,
                               has_kpm=has_kpm)
    return pl.pallas_call(
        kernel,
        out_shape=jax.ShapeDtypeStruct((B, H, T, dh), out_dtype),
        grid=(B, H, nq, nk),
        in_specs=in_specs,
        out_specs=pl.BlockSpec((None, None, tq, dh),
                               lambda b, h, qi, ki: (b, h, qi, 0)),
        scratch_shapes=[pltpu.VMEM((tq, 1), jnp.float32),
                        pltpu.VMEM((tq, 1), jnp.float32),
                        pltpu.VMEM((tq, dh), jnp.float32)],
        compiler_params=pltpu.CompilerParams(
            dimension_semantics=("parallel", "parallel", "parallel",
                                 "arbitrary"),
            vmem_limit_bytes=_ATTN_VMEM_LIMIT),
    )(*operands)


# ----------------------------------------------------------------------------
# Cross-attention kernel: grid (B, q_block, H); returns head-averaged weights
# ----------------------------------------------------------------------------
def _cross_attn_kernel(*refs, num_heads, has_kpm):
    q_ref, k_ref, v_ref = refs[:3]
    idx = 3
    kpm_ref = refs[idx] if has_kpm else None
    idx += 1 if has_kpm else 0
    o_ref, aw_ref = refs[idx], refs[idx + 1]

    h = pl.program_id(2)
    # (tq, dh) x (S, dh) -> (tq, S)
    s = jax.lax.dot_general(q_ref[...], k_ref[...], (((1,), (1,)), ((), ())),
                            preferred_element_type=jnp.float32)
    if has_kpm:
        s = s + kpm_ref[...]               # (1, S) key-padding bias
    m = jnp.max(s, axis=-1, keepdims=True)
    e = jnp.exp(s - m)
    # EXACT normalization: these probabilities are user-visible weights.
    p = e / jnp.sum(e, axis=-1, keepdims=True)

    o_ref[...] = jax.lax.dot_general(
        p.astype(jnp.bfloat16), v_ref[...], (((1,), (0,)), ((), ())),
        preferred_element_type=jnp.float32).astype(o_ref.dtype)

    @pl.when(h == 0)
    def _():
        aw_ref[...] = jnp.zeros_like(aw_ref)
    aw_ref[...] += p * (1.0 / num_heads)   # head-averaged attention weights


def cross_attention(q4, kv5, key_bias, *, out_dtype=jnp.bfloat16):
    """q4: (B, H, T, dh) bf16; kv5: (2, B, H, S, dh) bf16;
    key_bias: (B, 1, S) additive or None. Returns ((B,H,T,dh), (B,T,S))."""
    B, H, T, dh = q4.shape
    S = kv5.shape[3]
    # cap tq so the double-buffered (tq, S) f32 weights block stays modest
    tq_target = max(8, min(256, (2 << 20) // max(S, 1)))
    tq = _tile(T, tq_target, 8)
    nq = T // tq
    has_kpm = key_bias is not None

    in_specs = [
        pl.BlockSpec((None, None, tq, dh), lambda b, qi, h: (b, h, qi, 0)),
        pl.BlockSpec((None, None, None, S, dh),
                     lambda b, qi, h: (0, b, h, 0, 0)),
        pl.BlockSpec((None, None, None, S, dh),
                     lambda b, qi, h: (1, b, h, 0, 0)),
    ]
    operands = [q4, kv5, kv5]
    if has_kpm:
        in_specs.append(pl.BlockSpec((None, 1, S), lambda b, qi, h: (b, 0, 0)))
        operands.append(key_bias)

    kernel = functools.partial(_cross_attn_kernel, num_heads=H,
                               has_kpm=has_kpm)
    return pl.pallas_call(
        kernel,
        out_shape=(jax.ShapeDtypeStruct((B, H, T, dh), out_dtype),
                   jax.ShapeDtypeStruct((B, T, S), jnp.float32)),
        grid=(B, nq, H),
        in_specs=in_specs,
        out_specs=(pl.BlockSpec((None, None, tq, dh),
                                lambda b, qi, h: (b, h, qi, 0)),
                   pl.BlockSpec((None, tq, S), lambda b, qi, h: (b, qi, 0))),
        compiler_params=pltpu.CompilerParams(
            dimension_semantics=("parallel", "parallel", "arbitrary"),
            vmem_limit_bytes=_ATTN_VMEM_LIMIT),
    )(*operands)


# ----------------------------------------------------------------------------
# One-time weight preparation (fold scaling, fuse QKV/KV, transpose, bf16)
# ----------------------------------------------------------------------------
def prepare_params(raw, num_heads):
    D = raw["sa_out_w"].shape[0]
    dh = D // num_heads
    scaling = dh ** -0.5

    sa_w, sa_b = raw["sa_in_w"], raw["sa_in_b"]
    ca_w, ca_b = raw["ca_in_w"], raw["ca_in_b"]
    return {
        # self attention: fused QKV, q-scaling folded in, (K, N) bf16 layout
        "w_qkv": jnp.concatenate([sa_w[:D] * scaling, sa_w[D:]], axis=0)
                    .T.astype(jnp.bfloat16),
        "b_qkv": jnp.concatenate([sa_b[:D] * scaling, sa_b[D:]])
                    .astype(jnp.float32),
        "w_out_sa": raw["sa_out_w"].T.astype(jnp.bfloat16),
        "b_out_sa": raw["sa_out_b"].astype(jnp.float32),
        "ln1_g": raw["ln1_g"], "ln1_b": raw["ln1_b"],
        # cross attention: separate Q (scaled) and fused KV
        "w_q_ca": (ca_w[:D] * scaling).T.astype(jnp.bfloat16),
        "b_q_ca": (ca_b[:D] * scaling).astype(jnp.float32),
        "w_kv_ca": ca_w[D:].T.astype(jnp.bfloat16),
        "b_kv_ca": ca_b[D:].astype(jnp.float32),
        "w_out_ca": raw["ca_out_w"].T.astype(jnp.bfloat16),
        "b_out_ca": raw["ca_out_b"].astype(jnp.float32),
        "ln2_g": raw["ln2_g"], "ln2_b": raw["ln2_b"],
        # FFN
        "fc1_w": raw["fc1_w"].T.astype(jnp.bfloat16), "fc1_b": raw["fc1_b"],
        "fc2_w": raw["fc2_w"].T.astype(jnp.bfloat16), "fc2_b": raw["fc2_b"],
        "ln3_g": raw["ln3_g"], "ln3_b": raw["ln3_b"],
    }


# ----------------------------------------------------------------------------
# Full decoder-layer forward
# ----------------------------------------------------------------------------
def nstack2seq_decoder_layer_forward(prep, x, encoder_leaves,
                                     encoder_padding_mask,
                                     self_attn_mask=None,
                                     self_attn_padding_mask=None,
                                     causal=True, num_heads=4):
    """x: (T, B, D); encoder_leaves: (t, B, m, D); encoder_padding_mask: (B, m, t).

    causal=True generates the standard future mask in-kernel (equivalent to
    passing fairseq's buffered_future_mask as self_attn_mask)."""
    # TODO(synk): nstack_cross=True path requires args.dptree_class (not given);
    # the standard MultiheadAttention cross-attention branch is implemented.
    # TODO(synk): incremental_state / prev_*_attn_state caching not implemented;
    # dropout is a no-op in eval mode.
    T, B, D = x.shape
    t, b, m, c = encoder_leaves.shape
    S = m * t
    H = num_heads
    dh = D // H

    # seq-first -> batch-first rows, bf16 activation stream
    x_rows = jnp.transpose(x, (1, 0, 2)).reshape(B * T, D).astype(jnp.bfloat16)

    # ---- self attention block (post-norm) ----
    qkv = linear(x_rows, prep["w_qkv"], prep["b_qkv"])               # (B*T, 3D)
    qkv5 = qkv.reshape(B, T, 3, H, dh).transpose(2, 0, 3, 1, 4)      # (3,B,H,T,dh)

    sa_key_bias = None
    if self_attn_padding_mask is not None:
        sa_key_bias = jnp.where(self_attn_padding_mask, NEG_INF, 0.0).astype(
            jnp.float32).reshape(B, 1, T)
    attn_o = flash_self_attention(qkv5, self_attn_mask, sa_key_bias,
                                  causal=causal)                      # (B,H,T,dh)
    attn_rows = attn_o.transpose(0, 2, 1, 3).reshape(B * T, D)
    x_rows = linear_residual_ln(attn_rows, prep["w_out_sa"], prep["b_out_sa"],
                                x_rows, prep["ln1_g"], prep["ln1_b"])

    # ---- cross attention block (flattened encoder leaves) ----
    enc_rows = jnp.transpose(encoder_leaves, (1, 2, 0, 3)).reshape(
        B * S, D).astype(jnp.bfloat16)
    q = linear(x_rows, prep["w_q_ca"], prep["b_q_ca"])                # (B*T, D)
    q4 = q.reshape(B, T, H, dh).transpose(0, 2, 1, 3)                 # (B,H,T,dh)
    kv = linear(enc_rows, prep["w_kv_ca"], prep["b_kv_ca"])           # (B*S, 2D)
    kv5 = kv.reshape(B, S, 2, H, dh).transpose(2, 0, 3, 1, 4)         # (2,B,H,S,dh)

    ca_key_bias = None
    if encoder_padding_mask is not None:
        ca_key_bias = jnp.where(encoder_padding_mask.reshape(B, S), NEG_INF,
                                0.0).astype(jnp.float32).reshape(B, 1, S)
    cross_o, attn_weights = cross_attention(q4, kv5, ca_key_bias)
    cross_rows = cross_o.transpose(0, 2, 1, 3).reshape(B * T, D)
    x_rows = linear_residual_ln(cross_rows, prep["w_out_ca"], prep["b_out_ca"],
                                x_rows, prep["ln2_g"], prep["ln2_b"])

    # ---- feed-forward block (fc1+relu, then fc2+res+LN fused) ----
    h = linear(x_rows, prep["fc1_w"], prep["fc1_b"], activation="relu")
    y = linear_residual_ln(h, prep["fc2_w"], prep["fc2_b"], x_rows,
                           prep["ln3_g"], prep["ln3_b"],
                           out_dtype=jnp.float32)

    out = jnp.transpose(y.reshape(B, T, D), (1, 0, 2))                # (T, B, D)
    return out, attn_weights


# ----------------------------------------------------------------------------
# Deterministic parameter init (torch layout) + example run
# ----------------------------------------------------------------------------
def make_params(key, embed_dim, ffn_dim):
    ks = jax.random.split(key, 8)
    scale = 0.02
    D, F = embed_dim, ffn_dim
    return {
        "sa_in_w": scale * jax.random.normal(ks[0], (3 * D, D), jnp.float32),
        "sa_in_b": jnp.zeros((3 * D,), jnp.float32),
        "sa_out_w": scale * jax.random.normal(ks[1], (D, D), jnp.float32),
        "sa_out_b": jnp.zeros((D,), jnp.float32),
        "ca_in_w": scale * jax.random.normal(ks[2], (3 * D, D), jnp.float32),
        "ca_in_b": jnp.zeros((3 * D,), jnp.float32),
        "ca_out_w": scale * jax.random.normal(ks[3], (D, D), jnp.float32),
        "ca_out_b": jnp.zeros((D,), jnp.float32),
        "fc1_w": scale * jax.random.normal(ks[4], (F, D), jnp.float32),
        "fc1_b": jnp.zeros((F,), jnp.float32),
        "fc2_w": scale * jax.random.normal(ks[5], (D, F), jnp.float32),
        "fc2_b": jnp.zeros((D,), jnp.float32),
        "ln1_g": jnp.ones((D,), jnp.float32), "ln1_b": jnp.zeros((D,), jnp.float32),
        "ln2_g": jnp.ones((D,), jnp.float32), "ln2_b": jnp.zeros((D,), jnp.float32),
        "ln3_g": jnp.ones((D,), jnp.float32), "ln3_b": jnp.zeros((D,), jnp.float32),
    }


if __name__ == "__main__":
    T, B, D, H, FFN = 8, 2, 32, 4, 64    # decoder: len, batch, embed, heads, ffn
    t, m = 5, 2                          # encoder leaves: (t, B, m, D)

    key = jax.random.PRNGKey(0)
    k_params, k_x, k_enc = jax.random.split(key, 3)

    raw_params = make_params(k_params, D, FFN)
    prep = prepare_params(raw_params, num_heads=H)     # one-time weight prep

    x = jax.random.normal(k_x, (T, B, D), jnp.float32)
    encoder_leaves = jax.random.normal(k_enc, (t, B, m, D), jnp.float32)
    # encoder padding mask (B, m, t): pad the last leaf position of sentence 1.
    encoder_padding_mask = jnp.zeros((B, m, t), bool).at[:, 1, -1].set(True)

    fwd = jax.jit(functools.partial(nstack2seq_decoder_layer_forward,
                                    causal=True, num_heads=H))
    out, attn = fwd(prep, x, encoder_leaves, encoder_padding_mask)
    jax.block_until_ready((out, attn))

    assert out.shape == (T, B, D)
    assert attn.shape == (B, T, m * t)
    assert jnp.all(jnp.isfinite(out)) and jnp.all(jnp.isfinite(attn))
    # cross-attention weights use an exact softmax: rows sum to 1
    assert jnp.allclose(jnp.sum(attn, axis=-1), 1.0, atol=1e-3)
    print("KERNEL_OK")
</pallas_src>

<mosaic_0001>
module attributes {stable_mosaic.version = 11 : i64} {
  func.func @_linear_acc_kernel(%arg0: i32, %arg1: i32, %arg2: i32, %arg3: memref<16x32xbf16, #tpu.memory_space<vmem>>, %arg4: memref<32x96xbf16, #tpu.memory_space<vmem>>, %arg5: memref<1x96xf32, #tpu.memory_space<vmem>>, %arg6: memref<16x96xbf16, #tpu.memory_space<vmem>>, %arg7: memref<16x96xf32, #tpu.memory_space<vmem>>) attributes {dimension_semantics = [#tpu.dimension_semantics<parallel>, #tpu.dimension_semantics<parallel>, #tpu.dimension_semantics<arbitrary>], iteration_bounds = array<i64: 1, 1, 1>, scalar_prefetch = 0 : i64, scratch_operands = 1 : i64, tpu.core_type = #tpu.core_type<tc>, window_params = [{transform_indices = @transform_0, window_bounds = array<i64: 16, 32>}, {transform_indices = @transform_1, window_bounds = array<i64: 32, 96>}, {transform_indices = @transform_2, window_bounds = array<i64: 1, 96>}, {transform_indices = @transform_3, window_bounds = array<i64: 16, 96>}]} {
    %c0_i32 = arith.constant 0 : i32
    %0 = arith.cmpi eq, %arg2, %c0_i32 : i32
    %1 = arith.extui %0 : i1 to i32
    %c0_i32_0 = arith.constant 0 : i32
    %2 = arith.cmpi ne, %1, %c0_i32_0 : i32
    scf.if %2 {
      %cst_10 = arith.constant 0.000000e+00 : f32
      %12 = vector.broadcast %cst_10 : f32 to vector<16x96xf32>
      %c0_11 = arith.constant 0 : index
      %c0_12 = arith.constant 0 : index
      %13 = vector.load %arg7[%c0_11, %c0_12] : memref<16x96xf32, #tpu.memory_space<vmem>>, vector<16x96xf32>
      tpu.vector_store %arg7[%c0_11, %c0_12], %12 {strides = array<i32>} : memref<16x96xf32, #tpu.memory_space<vmem>>, vector<16x96xf32>,
    } else {
    }
    %c0 = arith.constant 0 : index
    %c0_1 = arith.constant 0 : index
    %3 = vector.load %arg7[%c0, %c0_1] : memref<16x96xf32, #tpu.memory_space<vmem>>, vector<16x96xf32>
    %c0_2 = arith.constant 0 : index
    %c0_3 = arith.constant 0 : index
    %4 = vector.load %arg3[%c0_2, %c0_3] : memref<16x32xbf16, #tpu.memory_space<vmem>>, vector<16x32xbf16>
    %c0_4 = arith.constant 0 : index
    %c0_5 = arith.constant 0 : index
    %5 = vector.load %arg4[%c0_4, %c0_5] : memref<32x96xbf16, #tpu.memory_space<vmem>>, vector<32x96xbf16>
    %cst = arith.constant dense<0.000000e+00> : vector<16x96xf32>
    %6 = tpu.matmul %4, %5, %cst {dimension_numbers = #tpu.dot_dimension_numbers<[1], [0], [0], [1], [0, 0, 1, 1], [], []>} : vector<16x32xbf16>, vector<32x96xbf16>, vector<16x96xf32> -> vector<16x96xf32>
    %7 = arith.addf %3, %6 : vector<16x96xf32>
    %c0_6 = arith.constant 0 : index
    %c0_7 = arith.constant 0 : index
    %8 = vector.load %arg7[%c0_6, %c0_7] : memref<16x96xf32, #tpu.memory_space<vmem>>, vector<16x96xf32>
    tpu.vector_store %arg7[%c0_6, %c0_7], %7 {strides = array<i32>} : memref<16x96xf32, #tpu.memory_space<vmem>>, vector<16x96xf32>,
    %c0_i32_8 = arith.constant 0 : i32
    %9 = arith.cmpi eq, %arg2, %c0_i32_8 : i32
    %10 = arith.extui %9 : i1 to i32
    %c0_i32_9 = arith.constant 0 : i32
    %11 = arith.cmpi ne, %10, %c0_i32_9 : i32
    scf.if %11 {
      %c0_10 = arith.constant 0 : index
      %c0_11 = arith.constant 0 : index
      %12 = vector.load %arg7[%c0_10, %c0_11] : memref<16x96xf32, #tpu.memory_space<vmem>>, vector<16x96xf32>
      %c0_12 = arith.constant 0 : index
      %c0_13 = arith.constant 0 : index
      %13 = vector.load %arg5[%c0_12, %c0_13] : memref<1x96xf32, #tpu.memory_space<vmem>>, vector<1x96xf32>
      %14 = vector.broadcast %13 : vector<1x96xf32> to vector<16x96xf32>
      %15 = arith.addf %12, %14 : vector<16x96xf32>
      %16 = arith.truncf %15 : vector<16x96xf32> to vector<16x96xbf16>
      %c0_14 = arith.constant 0 : index
      %c0_15 = arith.constant 0 : index
      %17 = vector.load %arg6[%c0_14, %c0_15] : memref<16x96xbf16, #tpu.memory_space<vmem>>, vector<16x96xbf16>
      tpu.vector_store %arg6[%c0_14, %c0_15], %16 {strides = array<i32>} : memref<16x96xbf16, #tpu.memory_space<vmem>>, vector<16x96xbf16>,
    } else {
    }
    return
  }
  func.func @transform_0(%arg0: i32, %arg1: i32, %arg2: i32) -> (i32, i32) {
    %c0_i32 = arith.constant 0 : i32
    return %arg0, %arg2 : i32, i32
  }
  func.func @transform_1(%arg0: i32, %arg1: i32, %arg2: i32) -> (i32, i32) {
    %c0_i32 = arith.constant 0 : i32
    return %arg2, %arg1 : i32, i32
  }
  func.func @transform_2(%arg0: i32, %arg1: i32, %arg2: i32) -> (i32, i32) {
    %c0_i32 = arith.constant 0 : i32
    %c0_i32_0 = arith.constant 0 : i32
    return %c0_i32, %arg1 : i32, i32
  }
  func.func @transform_3(%arg0: i32, %arg1: i32, %arg2: i32) -> (i32, i32) {
    %c0_i32 = arith.constant 0 : i32
    return %arg0, %arg1 : i32, i32
  }
}

module attributes {stable_mosaic.version = 11 : i64} {
  func.func @_flash_self_attn_kernel(%arg0: i32, %arg1: i32, %arg2: i32, %arg3: i32, %arg4: memref<1x1x1x8x8xbf16, #tpu.memory_space<vmem>>, %arg5: memref<1x1x1x8x8xbf16, #tpu.memory_space<vmem>>, %arg6: memref<1x1x1x8x8xbf16, #tpu.memory_space<vmem>>, %arg7: memref<1x1x8x8xbf16, #tpu.memory_space<vmem>>, %arg8: memref<8x1xf32, #tpu.memory_space<vmem>>, %arg9: memref<8x1xf32, #tpu.memory_space<vmem>>, %arg10: memref<8x8xf32, #tpu.memory_space<vmem>>) attributes {dimension_semantics = [#tpu.dimension_semantics<parallel>, #tpu.dimension_semantics<parallel>, #tpu.dimension_semantics<parallel>, #tpu.dimension_semantics<arbitrary>], iteration_bounds = array<i64: 2, 4, 1, 1>, scalar_prefetch = 0 : i64, scratch_operands = 3 : i64, tpu.core_type = #tpu.core_type<tc>, window_params = [{transform_indices = @transform_0, window_bounds = array<i64: 1, 1, 1, 8, 8>}, {transform_indices = @transform_1, window_bounds = array<i64: 1, 1, 1, 8, 8>}, {transform_indices = @transform_2, window_bounds = array<i64: 1, 1, 1, 8, 8>}, {transform_indices = @transform_3, window_bounds = array<i64: 1, 1, 8, 8>}]} {
    %c0_i32 = arith.constant 0 : i32
    %0 = arith.cmpi eq, %arg3, %c0_i32 : i32
    %1 = arith.extui %0 : i1 to i32
    %c0_i32_0 = arith.constant 0 : i32
    %2 = arith.cmpi ne, %1, %c0_i32_0 : i32
    scf.if %2 {
      %cst = arith.constant 0xFF800000 : f32
      %12 = vector.broadcast %cst : f32 to vector<8x1xf32>
      %c0 = arith.constant 0 : index
      %c0_5 = arith.constant 0 : index
      %13 = vector.load %arg8[%c0, %c0_5] : memref<8x1xf32, #tpu.memory_space<vmem>>, vector<8x1xf32>
      tpu.vector_store %arg8[%c0, %c0_5], %12 {strides = array<i32>} : memref<8x1xf32, #tpu.memory_space<vmem>>, vector<8x1xf32>,
      %cst_6 = arith.constant 0.000000e+00 : f32
      %14 = vector.broadcast %cst_6 : f32 to vector<8x1xf32>
      %c0_7 = arith.constant 0 : index
      %c0_8 = arith.constant 0 : index
      %15 = vector.load %arg9[%c0_7, %c0_8] : memref<8x1xf32, #tpu.memory_space<vmem>>, vector<8x1xf32>
      tpu.vector_store %arg9[%c0_7, %c0_8], %14 {strides = array<i32>} : memref<8x1xf32, #tpu.memory_space<vmem>>, vector<8x1xf32>,
      %cst_9 = arith.constant 0.000000e+00 : f32
      %16 = vector.broadcast %cst_9 : f32 to vector<8x8xf32>
      %c0_10 = arith.constant 0 : index
      %c0_11 = arith.constant 0 : index
      %17 = vector.load %arg10[%c0_10, %c0_11] : memref<8x8xf32, #tpu.memory_space<vmem>>, vector<8x8xf32>
      tpu.vector_store %arg10[%c0_10, %c0_11], %16 {strides = array<i32>} : memref<8x8xf32, #tpu.memory_space<vmem>>, vector<8x8xf32>,
    } else {
    }
    %c8_i32 = arith.constant 8 : i32
    %3 = arith.muli %arg3, %c8_i32 : i32
    %c8_i32_1 = arith.constant 8 : i32
    %4 = arith.muli %arg2, %c8_i32_1 : i32
    %c7_i32 = arith.constant 7 : i32
    %5 = arith.addi %4, %c7_i32 : i32
    %6 = arith.cmpi sle, %3, %5 : i32
    %7 = arith.extui %6 : i1 to i32
    %c0_i32_2 = arith.constant 0 : i32
    %8 = arith.cmpi ne, %7, %c0_i32_2 : i32
    scf.if %8 {
      %c0 = arith.constant 0 : index
      %c0_5 = arith.constant 0 : index
      %c0_6 = arith.constant 0 : index
      %c0_7 = arith.constant 0 : index
      %c0_8 = arith.constant 0 : index
      %12 = vector.load %arg4[%c0, %c0_5, %c0_6, %c0_7, %c0_8] : memref<1x1x1x8x8xbf16, #tpu.memory_space<vmem>>, vector<1x1x1x8x8xbf16>
      %13 = vector.shape_cast %12 : vector<1x1x1x8x8xbf16> to vector<8x8xbf16>
      %c0_9 = arith.constant 0 : index
      %c0_10 = arith.constant 0 : index
      %c0_11 = arith.constant 0 : index
      %c0_12 = arith.constant 0 : index
      %c0_13 = arith.constant 0 : index
      %14 = vector.load %arg5[%c0_9, %c0_10, %c0_11, %c0_12, %c0_13] : memref<1x1x1x8x8xbf16, #tpu.memory_space<vmem>>, vector<1x1x1x8x8xbf16>
      %15 = vector.shape_cast %14 : vector<1x1x1x8x8xbf16> to vector<8x8xbf16>
      %cst = arith.constant dense<0.000000e+00> : vector<8x8xf32>
      %16 = tpu.matmul %13, %15, %cst {dimension_numbers = #tpu.dot_dimension_numbers<[1], [1], [0], [0], [0, 0, 1, 0], [], []>} : vector<8x8xbf16>, vector<8x8xbf16>, vector<8x8xf32> -> vector<8x8xf32>
      %c8_i32_14 = arith.constant 8 : i32
      %17 = arith.muli %arg2, %c8_i32_14 : i32
      %18 = tpu.iota {dimensions = array<i32: 0>} : vector<8x8xi32>
      %19 = vector.broadcast %17 : i32 to vector<8x8xi32>
      %20 = arith.addi %19, %18 : vector<8x8xi32>
      %c8_i32_15 = arith.constant 8 : i32
      %21 = arith.muli %arg3, %c8_i32_15 : i32
      %22 = tpu.iota {dimensions = array<i32: 1>} : vector<8x8xi32>
      %23 = vector.broadcast %21 : i32 to vector<8x8xi32>
      %24 = arith.addi %23, %22 : vector<8x8xi32>
      %25 = arith.cmpi sgt, %24, %20 : vector<8x8xi32>
      %cst_16 = arith.constant -1.000000e+09 : f32
      %26 = vector.broadcast %cst_16 : f32 to vector<8x8xf32>
      %27 = arith.select %25, %26, %16 : vector<8x8xi1>, vector<8x8xf32>
      %c0_17 = arith.constant 0 : index
      %c0_18 = arith.constant 0 : index
      %28 = vector.load %arg8[%c0_17, %c0_18] : memref<8x1xf32, #tpu.memory_space<vmem>>, vector<8x1xf32>
      %cst_19 = arith.constant dense<0xFF800000> : vector<8xf32>
      %29 = vector.multi_reduction <maximumf>, %27, %cst_19 [1] : vector<8x8xf32> to vector<8xf32>
      %30 = vector.shape_cast %29 : vector<8xf32> to vector<8x1xf32>
      %31 = arith.maximumf %28, %30 : vector<8x1xf32>
      %32 = arith.subf %28, %31 : vector<8x1xf32>
      %33 = math.exp %32 : vector<8x1xf32>
      %34 = vector.broadcast %31 : vector<8x1xf32> to vector<8x8xf32>
      %35 = arith.subf %27, %34 : vector<8x8xf32>
      %36 = math.exp %35 : vector<8x8xf32>
      %c0_20 = arith.constant 0 : index
      %c0_21 = arith.constant 0 : index
      %37 = vector.load %arg9[%c0_20, %c0_21] : memref<8x1xf32, #tpu.memory_space<vmem>>, vector<8x1xf32>
      %38 = arith.mulf %33, %37 : vector<8x1xf32>
      %cst_22 = arith.constant dense<0.000000e+00> : vector<8xf32>
      %39 = vector.multi_reduction <add>, %36, %cst_22 [1] : vector<8x8xf32> to vector<8xf32>
      %40 = vector.shape_cast %39 : vector<8xf32> to vector<8x1xf32>
      %41 = arith.addf %38, %40 : vector<8x1xf32>
      %c0_23 = arith.constant 0 : index
      %c0_24 = arith.constant 0 : index
      %42 = vector.load %arg9[%c0_23, %c0_24] : memref<8x1xf32, #tpu.memory_space<vmem>>, vector<8x1xf32>
      tpu.vector_store %arg9[%c0_23, %c0_24], %41 {strides = array<i32>} : memref<8x1xf32, #tpu.memory_space<vmem>>, vector<8x1xf32>,
      %c0_25 = arith.constant 0 : index
      %c0_26 = arith.constant 0 : index
      %43 = vector.load %arg10[%c0_25, %c0_26] : memref<8x8xf32, #tpu.memory_space<vmem>>, vector<8x8xf32>
      %44 = vector.broadcast %33 : vector<8x1xf32> to vector<8x8xf32>
      %45 = arith.mulf %44, %43 : vector<8x8xf32>
      %46 = arith.truncf %36 : vector<8x8xf32> to vector<8x8xbf16>
      %c0_27 = arith.constant 0 : index
      %c0_28 = arith.constant 0 : index
      %c0_29 = arith.constant 0 : index
      %c0_30 = arith.constant 0 : index
      %c0_31 = arith.constant 0 : index
      %47 = vector.load %arg6[%c0_27, %c0_28, %c0_29, %c0_30, %c0_31] : memref<1x1x1x8x8xbf16, #tpu.memory_space<vmem>>, vector<1x1x1x8x8xbf16>
      %48 = vector.shape_cast %47 : vector<1x1x1x8x8xbf16> to vector<8x8xbf16>
      %cst_32 = arith.constant dense<0.000000e+00> : vector<8x8xf32>
      %49 = tpu.matmul %46, %48, %cst_32 {dimension_numbers = #tpu.dot_dimension_numbers<[1], [0], [0], [1], [0, 0, 1, 1], [], []>} : vector<8x8xbf16>, vector<8x8xbf16>, vector<8x8xf32> -> vector<8x8xf32>
      %50 = arith.addf %45, %49 : vector<8x8xf32>
      %c0_33 = arith.constant 0 : index
      %c0_34 = arith.constant 0 : index
      %51 = vector.load %arg10[%c0_33, %c0_34] : memref<8x8xf32, #tpu.memory_space<vmem>>, vector<8x8xf32>
      tpu.vector_store %arg10[%c0_33, %c0_34], %50 {strides = array<i32>} : memref<8x8xf32, #tpu.memory_space<vmem>>, vector<8x8xf32>,
      %c0_35 = arith.constant 0 : index
      %c0_36 = arith.constant 0 : index
      %52 = vector.load %arg8[%c0_35, %c0_36] : memref<8x1xf32, #tpu.memory_space<vmem>>, vector<8x1xf32>
      tpu.vector_store %arg8[%c0_35, %c0_36], %31 {strides = array<i32>} : memref<8x1xf32, #tpu.memory_space<vmem>>, vector<8x1xf32>,
    } else {
    }
    %c0_i32_3 = arith.constant 0 : i32
    %9 = arith.cmpi eq, %arg3, %c0_i32_3 : i32
    %10 = arith.extui %9 : i1 to i32
    %c0_i32_4 = arith.constant 0 : i32
    %11 = arith.cmpi ne, %10, %c0_i32_4 : i32
    scf.if %11 {
      %c0 = arith.constant 0 : index
      %c0_5 = arith.constant 0 : index
      %12 = vector.load %arg9[%c0, %c0_5] : memref<8x1xf32, #tpu.memory_space<vmem>>, vector<8x1xf32>
      %13 = tpu.reciprocal %12 {approx = true} : vector<8x1xf32> -> vector<8x1xf32>
      %c0_6 = arith.constant 0 : index
      %c0_7 = arith.constant 0 : index
      %14 = vector.load %arg10[%c0_6, %c0_7] : memref<8x8xf32, #tpu.memory_space<vmem>>, vector<8x8xf32>
      %15 = vector.broadcast %13 : vector<8x1xf32> to vector<8x8xf32>
      %16 = arith.mulf %14, %15 : vector<8x8xf32>
      %17 = arith.truncf %16 : vector<8x8xf32> to vector<8x8xbf16>
      %c0_8 = arith.constant 0 : index
      %c0_9 = arith.constant 0 : index
      %c0_10 = arith.constant 0 : index
      %c0_11 = arith.constant 0 : index
      %18 = vector.load %arg7[%c0_8, %c0_9, %c0_10, %c0_11] : memref<1x1x8x8xbf16, #tpu.memory_space<vmem>>, vector<1x1x8x8xbf16>
      %19 = vector.shape_cast %18 : vector<1x1x8x8xbf16> to vector<8x8xbf16>
      %20 = vector.shape_cast %17 : vector<8x8xbf16> to vector<1x1x8x8xbf16>
      tpu.vector_store %arg7[%c0_8, %c0_9, %c0_10, %c0_11], %20 {strides = array<i32>} : memref<1x1x8x8xbf16, #tpu.memory_space<vmem>>, vector<1x1x8x8xbf16>,
    } else {
    }
    return
  }
  func.func @transform_0(%arg0: i32, %arg1: i32, %arg2: i32, %arg3: i32) -> (i32, i32, i32, i32, i32) {
    %c0_i32 = arith.constant 0 : i32
    %c0_i32_0 = arith.constant 0 : i32
    %c0_i32_1 = arith.constant 0 : i32
    return %c0_i32, %arg0, %arg1, %arg2, %c0_i32_0 : i32, i32, i32, i32, i32
  }
  func.func @transform_1(%arg0: i32, %arg1: i32, %arg2: i32, %arg3: i32) -> (i32, i32, i32, i32, i32) {
    %c1_i32 = arith.constant 1 : i32
    %c0_i32 = arith.constant 0 : i32
    %c0_i32_0 = arith.constant 0 : i32
    return %c1_i32, %arg0, %arg1, %arg3, %c0_i32 : i32, i32, i32, i32, i32
  }
  func.func @transform_2(%arg0: i32, %arg1: i32, %arg2: i32, %arg3: i32) -> (i32, i32, i32, i32, i32) {
    %c2_i32 = arith.constant 2 : i32
    %c0_i32 = arith.constant 0 : i32
    %c0_i32_0 = arith.constant 0 : i32
    return %c2_i32, %arg0, %arg1, %arg3, %c0_i32 : i32, i32, i32, i32, i32
  }
  func.func @transform_3(%arg0: i32, %arg1: i32, %arg2: i32, %arg3: i32) -> (i32, i32, i32, i32) {
    %c0_i32 = arith.constant 0 : i32
    %c0_i32_0 = arith.constant 0 : i32
    return %arg0, %arg1, %arg2, %c0_i32 : i32, i32, i32, i32
  }
}

module attributes {stable_mosaic.version = 11 : i64} {
  func.func @_linear_acc_kernel(%arg0: i32, %arg1: i32, %arg2: i32, %arg3: memref<16x32xbf16, #tpu.memory_space<vmem>>, %arg4: memref<32x32xbf16, #tpu.memory_space<vmem>>, %arg5: memref<1x32xf32, #tpu.memory_space<vmem>>, %arg6: memref<16x32xbf16, #tpu.memory_space<vmem>>, %arg7: memref<16x32xf32, #tpu.memory_space<vmem>>) attributes {dimension_semantics = [#tpu.dimension_semantics<parallel>, #tpu.dimension_semantics<parallel>, #tpu.dimension_semantics<arbitrary>], iteration_bounds = array<i64: 1, 1, 1>, scalar_prefetch = 0 : i64, scratch_operands = 1 : i64, tpu.core_type = #tpu.core_type<tc>, window_params = [{transform_indices = @transform_0, window_bounds = array<i64: 16, 32>}, {transform_indices = @transform_1, window_bounds = array<i64: 32, 32>}, {transform_indices = @transform_2, window_bounds = array<i64: 1, 32>}, {transform_indices = @transform_3, window_bounds = array<i64: 16, 32>}]} {
    %c0_i32 = arith.constant 0 : i32
    %0 = arith.cmpi eq, %arg2, %c0_i32 : i32
    %1 = arith.extui %0 : i1 to i32
    %c0_i32_0 = arith.constant 0 : i32
    %2 = arith.cmpi ne, %1, %c0_i32_0 : i32
    scf.if %2 {
      %cst_10 = arith.constant 0.000000e+00 : f32
      %12 = vector.broadcast %cst_10 : f32 to vector<16x32xf32>
      %c0_11 = arith.constant 0 : index
      %c0_12 = arith.constant 0 : index
      %13 = vector.load %arg7[%c0_11, %c0_12] : memref<16x32xf32, #tpu.memory_space<vmem>>, vector<16x32xf32>
      tpu.vector_store %arg7[%c0_11, %c0_12], %12 {strides = array<i32>} : memref<16x32xf32, #tpu.memory_space<vmem>>, vector<16x32xf32>,
    } else {
    }
    %c0 = arith.constant 0 : index
    %c0_1 = arith.constant 0 : index
    %3 = vector.load %arg7[%c0, %c0_1] : memref<16x32xf32, #tpu.memory_space<vmem>>, vector<16x32xf32>
    %c0_2 = arith.constant 0 : index
    %c0_3 = arith.constant 0 : index
    %4 = vector.load %arg3[%c0_2, %c0_3] : memref<16x32xbf16, #tpu.memory_space<vmem>>, vector<16x32xbf16>
    %c0_4 = arith.constant 0 : index
    %c0_5 = arith.constant 0 : index
    %5 = vector.load %arg4[%c0_4, %c0_5] : memref<32x32xbf16, #tpu.memory_space<vmem>>, vector<32x32xbf16>
    %cst = arith.constant dense<0.000000e+00> : vector<16x32xf32>
    %6 = tpu.matmul %4, %5, %cst {dimension_numbers = #tpu.dot_dimension_numbers<[1], [0], [0], [1], [0, 0, 1, 1], [], []>} : vector<16x32xbf16>, vector<32x32xbf16>, vector<16x32xf32> -> vector<16x32xf32>
    %7 = arith.addf %3, %6 : vector<16x32xf32>
    %c0_6 = arith.constant 0 : index
    %c0_7 = arith.constant 0 : index
    %8 = vector.load %arg7[%c0_6, %c0_7] : memref<16x32xf32, #tpu.memory_space<vmem>>, vector<16x32xf32>
    tpu.vector_store %arg7[%c0_6, %c0_7], %7 {strides = array<i32>} : memref<16x32xf32, #tpu.memory_space<vmem>>, vector<16x32xf32>,
    %c0_i32_8 = arith.constant 0 : i32
    %9 = arith.cmpi eq, %arg2, %c0_i32_8 : i32
    %10 = arith.extui %9 : i1 to i32
    %c0_i32_9 = arith.constant 0 : i32
    %11 = arith.cmpi ne, %10, %c0_i32_9 : i32
    scf.if %11 {
      %c0_10 = arith.constant 0 : index
      %c0_11 = arith.constant 0 : index
      %12 = vector.load %arg7[%c0_10, %c0_11] : memref<16x32xf32, #tpu.memory_space<vmem>>, vector<16x32xf32>
      %c0_12 = arith.constant 0 : index
      %c0_13 = arith.constant 0 : index
      %13 = vector.load %arg5[%c0_12, %c0_13] : memref<1x32xf32, #tpu.memory_space<vmem>>, vector<1x32xf32>
      %14 = vector.broadcast %13 : vector<1x32xf32> to vector<16x32xf32>
      %15 = arith.addf %12, %14 : vector<16x32xf32>
      %16 = arith.truncf %15 : vector<16x32xf32> to vector<16x32xbf16>
      %c0_14 = arith.constant 0 : index
      %c0_15 = arith.constant 0 : index
      %17 = vector.load %arg6[%c0_14, %c0_15] : memref<16x32xbf16, #tpu.memory_space<vmem>>, vector<16x32xbf16>
      tpu.vector_store %arg6[%c0_14, %c0_15], %16 {strides = array<i32>} : memref<16x32xbf16, #tpu.memory_space<vmem>>, vector<16x32xbf16>,
    } else {
    }
    return
  }
  func.func @transform_0(%arg0: i32, %arg1: i32, %arg2: i32) -> (i32, i32) {
    %c0_i32 = arith.constant 0 : i32
    return %arg0, %arg2 : i32, i32
  }
  func.func @transform_1(%arg0: i32, %arg1: i32, %arg2: i32) -> (i32, i32) {
    %c0_i32 = arith.constant 0 : i32
    return %arg2, %arg1 : i32, i32
  }
  func.func @transform_2(%arg0: i32, %arg1: i32, %arg2: i32) -> (i32, i32) {
    %c0_i32 = arith.constant 0 : i32
    %c0_i32_0 = arith.constant 0 : i32
    return %c0_i32, %arg1 : i32, i32
  }
  func.func @transform_3(%arg0: i32, %arg1: i32, %arg2: i32) -> (i32, i32) {
    %c0_i32 = arith.constant 0 : i32
    return %arg0, %arg1 : i32, i32
  }
}

module attributes {stable_mosaic.version = 11 : i64} {
  func.func @_linear_res_ln_kernel(%arg0: i32, %arg1: i32, %arg2: memref<16x32xbf16, #tpu.memory_space<vmem>>, %arg3: memref<32x32xbf16, #tpu.memory_space<vmem>>, %arg4: memref<1x32xf32, #tpu.memory_space<vmem>>, %arg5: memref<16x32xbf16, #tpu.memory_space<vmem>>, %arg6: memref<1x32xf32, #tpu.memory_space<vmem>>, %arg7: memref<1x32xf32, #tpu.memory_space<vmem>>, %arg8: memref<16x32xbf16, #tpu.memory_space<vmem>>, %arg9: memref<16x32xf32, #tpu.memory_space<vmem>>) attributes {dimension_semantics = [#tpu.dimension_semantics<parallel>, #tpu.dimension_semantics<arbitrary>], iteration_bounds = array<i64: 1, 1>, scalar_prefetch = 0 : i64, scratch_operands = 1 : i64, tpu.core_type = #tpu.core_type<tc>, window_params = [{transform_indices = @transform_0, window_bounds = array<i64: 16, 32>}, {transform_indices = @transform_1, window_bounds = array<i64: 32, 32>}, {pipeline_mode = #tpu.pipeline_mode<synchronous>, transform_indices = @transform_2, window_bounds = array<i64: 1, 32>}, {transform_indices = @transform_3, window_bounds = array<i64: 16, 32>}, {pipeline_mode = #tpu.pipeline_mode<synchronous>, transform_indices = @transform_4, window_bounds = array<i64: 1, 32>}, {pipeline_mode = #tpu.pipeline_mode<synchronous>, transform_indices = @transform_5, window_bounds = array<i64: 1, 32>}, {transform_indices = @transform_6, window_bounds = array<i64: 16, 32>}]} {
    %c0_i32 = arith.constant 0 : i32
    %0 = arith.cmpi eq, %arg1, %c0_i32 : i32
    %1 = arith.extui %0 : i1 to i32
    %c0_i32_0 = arith.constant 0 : i32
    %2 = arith.cmpi ne, %1, %c0_i32_0 : i32
    scf.if %2 {
      %cst_10 = arith.constant 0.000000e+00 : f32
      %12 = vector.broadcast %cst_10 : f32 to vector<16x32xf32>
      %c0_11 = arith.constant 0 : index
      %c0_12 = arith.constant 0 : index
      %13 = vector.load %arg9[%c0_11, %c0_12] : memref<16x32xf32, #tpu.memory_space<vmem>>, vector<16x32xf32>
      tpu.vector_store %arg9[%c0_11, %c0_12], %12 {strides = array<i32>} : memref<16x32xf32, #tpu.memory_space<vmem>>, vector<16x32xf32>,
    } else {
    }
    %c0 = arith.constant 0 : index
    %c0_1 = arith.constant 0 : index
    %3 = vector.load %arg9[%c0, %c0_1] : memref<16x32xf32, #tpu.memory_space<vmem>>, vector<16x32xf32>
    %c0_2 = arith.constant 0 : index
    %c0_3 = arith.constant 0 : index
    %4 = vector.load %arg2[%c0_2, %c0_3] : memref<16x32xbf16, #tpu.memory_space<vmem>>, vector<16x32xbf16>
    %c0_4 = arith.constant 0 : index
    %c0_5 = arith.constant 0 : index
    %5 = vector.load %arg3[%c0_4, %c0_5] : memref<32x32xbf16, #tpu.memory_space<vmem>>, vector<32x32xbf16>
    %cst = arith.constant dense<0.000000e+00> : vector<16x32xf32>
    %6 = tpu.matmul %4, %5, %cst {dimension_numbers = #tpu.dot_dimension_numbers<[1], [0], [0], [1], [0, 0, 1, 1], [], []>} : vector<16x32xbf16>, vector<32x32xbf16>, vector<16x32xf32> -> vector<16x32xf32>
    %7 = arith.addf %3, %6 : vector<16x32xf32>
    %c0_6 = arith.constant 0 : index
    %c0_7 = arith.constant 0 : index
    %8 = vector.load %arg9[%c0_6, %c0_7] : memref<16x32xf32, #tpu.memory_space<vmem>>, vector<16x32xf32>
    tpu.vector_store %arg9[%c0_6, %c0_7], %7 {strides = array<i32>} : memref<16x32xf32, #tpu.memory_space<vmem>>, vector<16x32xf32>,
    %c0_i32_8 = arith.constant 0 : i32
    %9 = arith.cmpi eq, %arg1, %c0_i32_8 : i32
    %10 = arith.extui %9 : i1 to i32
    %c0_i32_9 = arith.constant 0 : i32
    %11 = arith.cmpi ne, %10, %c0_i32_9 : i32
    scf.if %11 {
      %c0_10 = arith.constant 0 : index
      %c0_11 = arith.constant 0 : index
      %12 = vector.load %arg9[%c0_10, %c0_11] : memref<16x32xf32, #tpu.memory_space<vmem>>, vector<16x32xf32>
      %c0_12 = arith.constant 0 : index
      %c0_13 = arith.constant 0 : index
      %13 = vector.load %arg4[%c0_12, %c0_13] : memref<1x32xf32, #tpu.memory_space<vmem>>, vector<1x32xf32>
      %14 = vector.broadcast %13 : vector<1x32xf32> to vector<16x32xf32>
      %15 = arith.addf %12, %14 : vector<16x32xf32>
      %c0_14 = arith.constant 0 : index
      %c0_15 = arith.constant 0 : index
      %16 = vector.load %arg5[%c0_14, %c0_15] : memref<16x32xbf16, #tpu.memory_space<vmem>>, vector<16x32xbf16>
      %17 = arith.extf %16 : vector<16x32xbf16> to vector<16x32xf32>
      %18 = arith.addf %15, %17 : vector<16x32xf32>
      %cst_16 = arith.constant dense<0.000000e+00> : vector<16xf32>
      %19 = vector.multi_reduction <add>, %18, %cst_16 [1] : vector<16x32xf32> to vector<16xf32>
      %20 = vector.shape_cast %19 : vector<16xf32> to vector<16x1xf32>
      %cst_17 = arith.constant 3.200000e+01 : f32
      %21 = vector.broadcast %cst_17 : f32 to vector<16x1xf32>
      %22 = arith.divf %20, %21 : vector<16x1xf32>
      %23 = vector.broadcast %22 : vector<16x1xf32> to vector<16x32xf32>
      %24 = arith.subf %18, %23 : vector<16x32xf32>
      %25 = arith.mulf %24, %24 : vector<16x32xf32>
      %cst_18 = arith.constant dense<0.000000e+00> : vector<16xf32>
      %26 = vector.multi_reduction <add>, %25, %cst_18 [1] : vector<16x32xf32> to vector<16xf32>
      %27 = vector.shape_cast %26 : vector<16xf32> to vector<16x1xf32>
      %cst_19 = arith.constant 3.200000e+01 : f32
      %28 = vector.broadcast %cst_19 : f32 to vector<16x1xf32>
      %29 = arith.divf %27, %28 : vector<16x1xf32>
      %cst_20 = arith.constant 9.99999974E-6 : f32
      %30 = vector.broadcast %cst_20 : f32 to vector<16x1xf32>
      %31 = arith.addf %29, %30 : vector<16x1xf32>
      %32 = math.rsqrt %31 : vector<16x1xf32>
      %33 = vector.broadcast %32 : vector<16x1xf32> to vector<16x32xf32>
      %34 = arith.mulf %24, %33 : vector<16x32xf32>
      %c0_21 = arith.constant 0 : index
      %c0_22 = arith.constant 0 : index
      %35 = vector.load %arg6[%c0_21, %c0_22] : memref<1x32xf32, #tpu.memory_space<vmem>>, vector<1x32xf32>
      %36 = vector.broadcast %35 : vector<1x32xf32> to vector<16x32xf32>
      %37 = arith.mulf %34, %36 : vector<16x32xf32>
      %c0_23 = arith.constant 0 : index
      %c0_24 = arith.constant 0 : index
      %38 = vector.load %arg7[%c0_23, %c0_24] : memref<1x32xf32, #tpu.memory_space<vmem>>, vector<1x32xf32>
      %39 = vector.broadcast %38 : vector<1x32xf32> to vector<16x32xf32>
      %40 = arith.addf %37, %39 : vector<16x32xf32>
      %41 = arith.truncf %40 : vector<16x32xf32> to vector<16x32xbf16>
      %c0_25 = arith.constant 0 : index
      %c0_26 = arith.constant 0 : index
      %42 = vector.load %arg8[%c0_25, %c0_26] : memref<16x32xbf16, #tpu.memory_space<vmem>>, vector<16x32xbf16>
      tpu.vector_store %arg8[%c0_25, %c0_26], %41 {strides = array<i32>} : memref<16x32xbf16, #tpu.memory_space<vmem>>, vector<16x32xbf16>,
    } else {
    }
    return
  }
  func.func @transform_0(%arg0: i32, %arg1: i32) -> (i32, i32) {
    %c0_i32 = arith.constant 0 : i32
    return %arg0, %arg1 : i32, i32
  }
  func.func @transform_1(%arg0: i32, %arg1: i32) -> (i32, i32) {
    %c0_i32 = arith.constant 0 : i32
    %c0_i32_0 = arith.constant 0 : i32
    return %arg1, %c0_i32 : i32, i32
  }
  func.func @transform_2(%arg0: i32, %arg1: i32) -> (i32, i32) {
    %c0_i32 = arith.constant 0 : i32
    %c0_i32_0 = arith.constant 0 : i32
    %c0_i32_1 = arith.constant 0 : i32
    return %c0_i32, %c0_i32_0 : i32, i32
  }
  func.func @transform_3(%arg0: i32, %arg1: i32) -> (i32, i32) {
    %c0_i32 = arith.constant 0 : i32
    %c0_i32_0 = arith.constant 0 : i32
    return %arg0, %c0_i32 : i32, i32
  }
  func.func @transform_4(%arg0: i32, %arg1: i32) -> (i32, i32) {
    %c0_i32 = arith.constant 0 : i32
    %c0_i32_0 = arith.constant 0 : i32
    %c0_i32_1 = arith.constant 0 : i32
    return %c0_i32, %c0_i32_0 : i32, i32
  }
  func.func @transform_5(%arg0: i32, %arg1: i32) -> (i32, i32) {
    %c0_i32 = arith.constant 0 : i32
    %c0_i32_0 = arith.constant 0 : i32
    %c0_i32_1 = arith.constant 0 : i32
    return %c0_i32, %c0_i32_0 : i32, i32
  }
  func.func @transform_6(%arg0: i32, %arg1: i32) -> (i32, i32) {
    %c0_i32 = arith.constant 0 : i32
    %c0_i32_0 = arith.constant 0 : i32
    return %arg0, %c0_i32 : i32, i32
  }
}

module attributes {stable_mosaic.version = 11 : i64} {
  func.func @_linear_acc_kernel(%arg0: i32, %arg1: i32, %arg2: i32, %arg3: memref<20x32xbf16, #tpu.memory_space<vmem>>, %arg4: memref<32x64xbf16, #tpu.memory_space<vmem>>, %arg5: memref<1x64xf32, #tpu.memory_space<vmem>>, %arg6: memref<20x64xbf16, #tpu.memory_space<vmem>>, %arg7: memref<20x64xf32, #tpu.memory_space<vmem>>) attributes {dimension_semantics = [#tpu.dimension_semantics<parallel>, #tpu.dimension_semantics<parallel>, #tpu.dimension_semantics<arbitrary>], iteration_bounds = array<i64: 1, 1, 1>, scalar_prefetch = 0 : i64, scratch_operands = 1 : i64, tpu.core_type = #tpu.core_type<tc>, window_params = [{transform_indices = @transform_0, window_bounds = array<i64: 20, 32>}, {transform_indices = @transform_1, window_bounds = array<i64: 32, 64>}, {transform_indices = @transform_2, window_bounds = array<i64: 1, 64>}, {transform_indices = @transform_3, window_bounds = array<i64: 20, 64>}]} {
    %c0_i32 = arith.constant 0 : i32
    %0 = arith.cmpi eq, %arg2, %c0_i32 : i32
    %1 = arith.extui %0 : i1 to i32
    %c0_i32_0 = arith.constant 0 : i32
    %2 = arith.cmpi ne, %1, %c0_i32_0 : i32
    scf.if %2 {
      %cst_10 = arith.constant 0.000000e+00 : f32
      %12 = vector.broadcast %cst_10 : f32 to vector<20x64xf32>
      %c0_11 = arith.constant 0 : index
      %c0_12 = arith.constant 0 : index
      %13 = vector.load %arg7[%c0_11, %c0_12] : memref<20x64xf32, #tpu.memory_space<vmem>>, vector<20x64xf32>
      tpu.vector_store %arg7[%c0_11, %c0_12], %12 {strides = array<i32>} : memref<20x64xf32, #tpu.memory_space<vmem>>, vector<20x64xf32>,
    } else {
    }
    %c0 = arith.constant 0 : index
    %c0_1 = arith.constant 0 : index
    %3 = vector.load %arg7[%c0, %c0_1] : memref<20x64xf32, #tpu.memory_space<vmem>>, vector<20x64xf32>
    %c0_2 = arith.constant 0 : index
    %c0_3 = arith.constant 0 : index
    %4 = vector.load %arg3[%c0_2, %c0_3] : memref<20x32xbf16, #tpu.memory_space<vmem>>, vector<20x32xbf16>
    %c0_4 = arith.constant 0 : index
    %c0_5 = arith.constant 0 : index
    %5 = vector.load %arg4[%c0_4, %c0_5] : memref<32x64xbf16, #tpu.memory_space<vmem>>, vector<32x64xbf16>
    %cst = arith.constant dense<0.000000e+00> : vector<20x64xf32>
    %6 = tpu.matmul %4, %5, %cst {dimension_numbers = #tpu.dot_dimension_numbers<[1], [0], [0], [1], [0, 0, 1, 1], [], []>} : vector<20x32xbf16>, vector<32x64xbf16>, vector<20x64xf32> -> vector<20x64xf32>
    %7 = arith.addf %3, %6 : vector<20x64xf32>
    %c0_6 = arith.constant 0 : index
    %c0_7 = arith.constant 0 : index
    %8 = vector.load %arg7[%c0_6, %c0_7] : memref<20x64xf32, #tpu.memory_space<vmem>>, vector<20x64xf32>
    tpu.vector_store %arg7[%c0_6, %c0_7], %7 {strides = array<i32>} : memref<20x64xf32, #tpu.memory_space<vmem>>, vector<20x64xf32>,
    %c0_i32_8 = arith.constant 0 : i32
    %9 = arith.cmpi eq, %arg2, %c0_i32_8 : i32
    %10 = arith.extui %9 : i1 to i32
    %c0_i32_9 = arith.constant 0 : i32
    %11 = arith.cmpi ne, %10, %c0_i32_9 : i32
    scf.if %11 {
      %c0_10 = arith.constant 0 : index
      %c0_11 = arith.constant 0 : index
      %12 = vector.load %arg7[%c0_10, %c0_11] : memref<20x64xf32, #tpu.memory_space<vmem>>, vector<20x64xf32>
      %c0_12 = arith.constant 0 : index
      %c0_13 = arith.constant 0 : index
      %13 = vector.load %arg5[%c0_12, %c0_13] : memref<1x64xf32, #tpu.memory_space<vmem>>, vector<1x64xf32>
      %14 = vector.broadcast %13 : vector<1x64xf32> to vector<20x64xf32>
      %15 = arith.addf %12, %14 : vector<20x64xf32>
      %16 = arith.truncf %15 : vector<20x64xf32> to vector<20x64xbf16>
      %c0_14 = arith.constant 0 : index
      %c0_15 = arith.constant 0 : index
      %17 = vector.load %arg6[%c0_14, %c0_15] : memref<20x64xbf16, #tpu.memory_space<vmem>>, vector<20x64xbf16>
      tpu.vector_store %arg6[%c0_14, %c0_15], %16 {strides = array<i32>} : memref<20x64xbf16, #tpu.memory_space<vmem>>, vector<20x64xbf16>,
    } else {
    }
    return
  }
  func.func @transform_0(%arg0: i32, %arg1: i32, %arg2: i32) -> (i32, i32) {
    %c0_i32 = arith.constant 0 : i32
    return %arg0, %arg2 : i32, i32
  }
  func.func @transform_1(%arg0: i32, %arg1: i32, %arg2: i32) -> (i32, i32) {
    %c0_i32 = arith.constant 0 : i32
    return %arg2, %arg1 : i32, i32
  }
  func.func @transform_2(%arg0: i32, %arg1: i32, %arg2: i32) -> (i32, i32) {
    %c0_i32 = arith.constant 0 : i32
    %c0_i32_0 = arith.constant 0 : i32
    return %c0_i32, %arg1 : i32, i32
  }
  func.func @transform_3(%arg0: i32, %arg1: i32, %arg2: i32) -> (i32, i32) {
    %c0_i32 = arith.constant 0 : i32
    return %arg0, %arg1 : i32, i32
  }
}

module attributes {stable_mosaic.version = 11 : i64} {
  func.func @_cross_attn_kernel(%arg0: i32, %arg1: i32, %arg2: i32, %arg3: memref<1x1x8x8xbf16, #tpu.memory_space<vmem>>, %arg4: memref<1x1x1x10x8xbf16, #tpu.memory_space<vmem>>, %arg5: memref<1x1x1x10x8xbf16, #tpu.memory_space<vmem>>, %arg6: memref<1x1x10xf32, #tpu.memory_space<vmem>>, %arg7: memref<1x1x8x8xbf16, #tpu.memory_space<vmem>>, %arg8: memref<1x8x10xf32, #tpu.memory_space<vmem>>) attributes {dimension_semantics = [#tpu.dimension_semantics<parallel>, #tpu.dimension_semantics<parallel>, #tpu.dimension_semantics<arbitrary>], iteration_bounds = array<i64: 2, 1, 4>, scalar_prefetch = 0 : i64, scratch_operands = 0 : i64, tpu.core_type = #tpu.core_type<tc>, window_params = [{transform_indices = @transform_0, window_bounds = array<i64: 1, 1, 8, 8>}, {transform_indices = @transform_1, window_bounds = array<i64: 1, 1, 1, 10, 8>}, {transform_indices = @transform_2, window_bounds = array<i64: 1, 1, 1, 10, 8>}, {transform_indices = @transform_3, window_bounds = array<i64: 1, 1, 10>}, {transform_indices = @transform_4, window_bounds = array<i64: 1, 1, 8, 8>}, {transform_indices = @transform_5, window_bounds = array<i64: 1, 8, 10>}]} {
    %c0 = arith.constant 0 : index
    %c0_0 = arith.constant 0 : index
    %c0_1 = arith.constant 0 : index
    %c0_2 = arith.constant 0 : index
    %0 = vector.load %arg3[%c0, %c0_0, %c0_1, %c0_2] : memref<1x1x8x8xbf16, #tpu.memory_space<vmem>>, vector<1x1x8x8xbf16>
    %1 = vector.shape_cast %0 : vector<1x1x8x8xbf16> to vector<8x8xbf16>
    %c0_3 = arith.constant 0 : index
    %c0_4 = arith.constant 0 : index
    %c0_5 = arith.constant 0 : index
    %c0_6 = arith.constant 0 : index
    %c0_7 = arith.constant 0 : index
    %2 = vector.load %arg4[%c0_3, %c0_4, %c0_5, %c0_6, %c0_7] : memref<1x1x1x10x8xbf16, #tpu.memory_space<vmem>>, vector<1x1x1x10x8xbf16>
    %3 = vector.shape_cast %2 : vector<1x1x1x10x8xbf16> to vector<10x8xbf16>
    %cst = arith.constant dense<0.000000e+00> : vector<8x10xf32>
    %4 = tpu.matmul %1, %3, %cst {dimension_numbers = #tpu.dot_dimension_numbers<[1], [1], [0], [0], [0, 0, 1, 0], [], []>} : vector<8x8xbf16>, vector<10x8xbf16>, vector<8x10xf32> -> vector<8x10xf32>
    %c0_8 = arith.constant 0 : index
    %c0_9 = arith.constant 0 : index
    %c0_10 = arith.constant 0 : index
    %5 = vector.load %arg6[%c0_8, %c0_9, %c0_10] : memref<1x1x10xf32, #tpu.memory_space<vmem>>, vector<1x1x10xf32>
    %6 = vector.shape_cast %5 : vector<1x1x10xf32> to vector<1x10xf32>
    %7 = vector.broadcast %6 : vector<1x10xf32> to vector<8x10xf32>
    %8 = arith.addf %4, %7 : vector<8x10xf32>
    %cst_11 = arith.constant dense<0xFF800000> : vector<8xf32>
    %9 = vector.multi_reduction <maximumf>, %8, %cst_11 [1] : vector<8x10xf32> to vector<8xf32>
    %10 = vector.shape_cast %9 : vector<8xf32> to vector<8x1xf32>
    %11 = vector.broadcast %10 : vector<8x1xf32> to vector<8x10xf32>
    %12 = arith.subf %8, %11 : vector<8x10xf32>
    %13 = math.exp %12 : vector<8x10xf32>
    %cst_12 = arith.constant dense<0.000000e+00> : vector<8xf32>
    %14 = vector.multi_reduction <add>, %13, %cst_12 [1] : vector<8x10xf32> to vector<8xf32>
    %15 = vector.shape_cast %14 : vector<8xf32> to vector<8x1xf32>
    %16 = vector.broadcast %15 : vector<8x1xf32> to vector<8x10xf32>
    %17 = arith.divf %13, %16 : vector<8x10xf32>
    %18 = arith.truncf %17 : vector<8x10xf32> to vector<8x10xbf16>
    %c0_13 = arith.constant 0 : index
    %c0_14 = arith.constant 0 : index
    %c0_15 = arith.constant 0 : index
    %c0_16 = arith.constant 0 : index
    %c0_17 = arith.constant 0 : index
    %19 = vector.load %arg5[%c0_13, %c0_14, %c0_15, %c0_16, %c0_17] : memref<1x1x1x10x8xbf16, #tpu.memory_space<vmem>>, vector<1x1x1x10x8xbf16>
    %20 = vector.shape_cast %19 : vector<1x1x1x10x8xbf16> to vector<10x8xbf16>
    %cst_18 = arith.constant dense<0.000000e+00> : vector<8x8xf32>
    %21 = tpu.matmul %18, %20, %cst_18 {dimension_numbers = #tpu.dot_dimension_numbers<[1], [0], [0], [1], [0, 0, 1, 1], [], []>} : vector<8x10xbf16>, vector<10x8xbf16>, vector<8x8xf32> -> vector<8x8xf32>
    %22 = arith.truncf %21 : vector<8x8xf32> to vector<8x8xbf16>
    %c0_19 = arith.constant 0 : index
    %c0_20 = arith.constant 0 : index
    %c0_21 = arith.constant 0 : index
    %c0_22 = arith.constant 0 : index
    %23 = vector.load %arg7[%c0_19, %c0_20, %c0_21, %c0_22] : memref<1x1x8x8xbf16, #tpu.memory_space<vmem>>, vector<1x1x8x8xbf16>
    %24 = vector.shape_cast %23 : vector<1x1x8x8xbf16> to vector<8x8xbf16>
    %25 = vector.shape_cast %22 : vector<8x8xbf16> to vector<1x1x8x8xbf16>
    tpu.vector_store %arg7[%c0_19, %c0_20, %c0_21, %c0_22], %25 {strides = array<i32>} : memref<1x1x8x8xbf16, #tpu.memory_space<vmem>>, vector<1x1x8x8xbf16>,
    %c0_i32 = arith.constant 0 : i32
    %26 = arith.cmpi eq, %arg2, %c0_i32 : i32
    %27 = arith.extui %26 : i1 to i32
    %c0_i32_23 = arith.constant 0 : i32
    %28 = arith.cmpi ne, %27, %c0_i32_23 : i32
    scf.if %28 {
      %cst_31 = arith.constant 0.000000e+00 : f32
      %37 = vector.broadcast %cst_31 : f32 to vector<8x10xf32>
      %c0_32 = arith.constant 0 : index
      %c0_33 = arith.constant 0 : index
      %c0_34 = arith.constant 0 : index
      %38 = vector.load %arg8[%c0_32, %c0_33, %c0_34] : memref<1x8x10xf32, #tpu.memory_space<vmem>>, vector<1x8x10xf32>
      %39 = vector.shape_cast %38 : vector<1x8x10xf32> to vector<8x10xf32>
      %40 = vector.shape_cast %37 : vector<8x10xf32> to vector<1x8x10xf32>
      tpu.vector_store %arg8[%c0_32, %c0_33, %c0_34], %40 {strides = array<i32>} : memref<1x8x10xf32, #tpu.memory_space<vmem>>, vector<1x8x10xf32>,
    } else {
    }
    %c0_24 = arith.constant 0 : index
    %c0_25 = arith.constant 0 : index
    %c0_26 = arith.constant 0 : index
    %29 = vector.load %arg8[%c0_24, %c0_25, %c0_26] : memref<1x8x10xf32, #tpu.memory_space<vmem>>, vector<1x8x10xf32>
    %30 = vector.shape_cast %29 : vector<1x8x10xf32> to vector<8x10xf32>
    %cst_27 = arith.constant 2.500000e-01 : f32
    %31 = vector.broadcast %cst_27 : f32 to vector<8x10xf32>
    %32 = arith.mulf %17, %31 : vector<8x10xf32>
    %33 = arith.addf %30, %32 : vector<8x10xf32>
    %c0_28 = arith.constant 0 : index
    %c0_29 = arith.constant 0 : index
    %c0_30 = arith.constant 0 : index
    %34 = vector.load %arg8[%c0_28, %c0_29, %c0_30] : memref<1x8x10xf32, #tpu.memory_space<vmem>>, vector<1x8x10xf32>
    %35 = vector.shape_cast %34 : vector<1x8x10xf32> to vector<8x10xf32>
    %36 = vector.shape_cast %33 : vector<8x10xf32> to vector<1x8x10xf32>
    tpu.vector_store %arg8[%c0_28, %c0_29, %c0_30], %36 {strides = array<i32>} : memref<1x8x10xf32, #tpu.memory_space<vmem>>, vector<1x8x10xf32>,
    return
  }
  func.func @transform_0(%arg0: i32, %arg1: i32, %arg2: i32) -> (i32, i32, i32, i32) {
    %c0_i32 = arith.constant 0 : i32
    %c0_i32_0 = arith.constant 0 : i32
    return %arg0, %arg2, %arg1, %c0_i32 : i32, i32, i32, i32
  }
  func.func @transform_1(%arg0: i32, %arg1: i32, %arg2: i32) -> (i32, i32, i32, i32, i32) {
    %c0_i32 = arith.constant 0 : i32
    %c0_i32_0 = arith.constant 0 : i32
    %c0_i32_1 = arith.constant 0 : i32
    %c0_i32_2 = arith.constant 0 : i32
    return %c0_i32, %arg0, %arg2, %c0_i32_0, %c0_i32_1 : i32, i32, i32, i32, i32
  }
  func.func @transform_2(%arg0: i32, %arg1: i32, %arg2: i32) -> (i32, i32, i32, i32, i32) {
    %c1_i32 = arith.constant 1 : i32
    %c0_i32 = arith.constant 0 : i32
    %c0_i32_0 = arith.constant 0 : i32
    %c0_i32_1 = arith.constant 0 : i32
    return %c1_i32, %arg0, %arg2, %c0_i32, %c0_i32_0 : i32, i32, i32, i32, i32
  }
  func.func @transform_3(%arg0: i32, %arg1: i32, %arg2: i32) -> (i32, i32, i32) {
    %c0_i32 = arith.constant 0 : i32
    %c0_i32_0 = arith.constant 0 : i32
    %c0_i32_1 = arith.constant 0 : i32
    return %arg0, %c0_i32, %c0_i32_0 : i32, i32, i32
  }
  func.func @transform_4(%arg0: i32, %arg1: i32, %arg2: i32) -> (i32, i32, i32, i32) {
    %c0_i32 = arith.constant 0 : i32
    %c0_i32_0 = arith.constant 0 : i32
    return %arg0, %arg2, %arg1, %c0_i32 : i32, i32, i32, i32
  }
  func.func @transform_5(%arg0: i32, %arg1: i32, %arg2: i32) -> (i32, i32, i32) {
    %c0_i32 = arith.constant 0 : i32
    %c0_i32_0 = arith.constant 0 : i32
    return %arg0, %arg1, %c0_i32 : i32, i32, i32
  }
}

module attributes {stable_mosaic.version = 11 : i64} {
  func.func @_linear_acc_kernel(%arg0: i32, %arg1: i32, %arg2: i32, %arg3: memref<16x32xbf16, #tpu.memory_space<vmem>>, %arg4: memref<32x64xbf16, #tpu.memory_space<vmem>>, %arg5: memref<1x64xf32, #tpu.memory_space<vmem>>, %arg6: memref<16x64xbf16, #tpu.memory_space<vmem>>, %arg7: memref<16x64xf32, #tpu.memory_space<vmem>>) attributes {dimension_semantics = [#tpu.dimension_semantics<parallel>, #tpu.dimension_semantics<parallel>, #tpu.dimension_semantics<arbitrary>], iteration_bounds = array<i64: 1, 1, 1>, scalar_prefetch = 0 : i64, scratch_operands = 1 : i64, tpu.core_type = #tpu.core_type<tc>, window_params = [{transform_indices = @transform_0, window_bounds = array<i64: 16, 32>}, {transform_indices = @transform_1, window_bounds = array<i64: 32, 64>}, {transform_indices = @transform_2, window_bounds = array<i64: 1, 64>}, {transform_indices = @transform_3, window_bounds = array<i64: 16, 64>}]} {
    %c0_i32 = arith.constant 0 : i32
    %0 = arith.cmpi eq, %arg2, %c0_i32 : i32
    %1 = arith.extui %0 : i1 to i32
    %c0_i32_0 = arith.constant 0 : i32
    %2 = arith.cmpi ne, %1, %c0_i32_0 : i32
    scf.if %2 {
      %cst_10 = arith.constant 0.000000e+00 : f32
      %12 = vector.broadcast %cst_10 : f32 to vector<16x64xf32>
      %c0_11 = arith.constant 0 : index
      %c0_12 = arith.constant 0 : index
      %13 = vector.load %arg7[%c0_11, %c0_12] : memref<16x64xf32, #tpu.memory_space<vmem>>, vector<16x64xf32>
      tpu.vector_store %arg7[%c0_11, %c0_12], %12 {strides = array<i32>} : memref<16x64xf32, #tpu.memory_space<vmem>>, vector<16x64xf32>,
    } else {
    }
    %c0 = arith.constant 0 : index
    %c0_1 = arith.constant 0 : index
    %3 = vector.load %arg7[%c0, %c0_1] : memref<16x64xf32, #tpu.memory_space<vmem>>, vector<16x64xf32>
    %c0_2 = arith.constant 0 : index
    %c0_3 = arith.constant 0 : index
    %4 = vector.load %arg3[%c0_2, %c0_3] : memref<16x32xbf16, #tpu.memory_space<vmem>>, vector<16x32xbf16>
    %c0_4 = arith.constant 0 : index
    %c0_5 = arith.constant 0 : index
    %5 = vector.load %arg4[%c0_4, %c0_5] : memref<32x64xbf16, #tpu.memory_space<vmem>>, vector<32x64xbf16>
    %cst = arith.constant dense<0.000000e+00> : vector<16x64xf32>
    %6 = tpu.matmul %4, %5, %cst {dimension_numbers = #tpu.dot_dimension_numbers<[1], [0], [0], [1], [0, 0, 1, 1], [], []>} : vector<16x32xbf16>, vector<32x64xbf16>, vector<16x64xf32> -> vector<16x64xf32>
    %7 = arith.addf %3, %6 : vector<16x64xf32>
    %c0_6 = arith.constant 0 : index
    %c0_7 = arith.constant 0 : index
    %8 = vector.load %arg7[%c0_6, %c0_7] : memref<16x64xf32, #tpu.memory_space<vmem>>, vector<16x64xf32>
    tpu.vector_store %arg7[%c0_6, %c0_7], %7 {strides = array<i32>} : memref<16x64xf32, #tpu.memory_space<vmem>>, vector<16x64xf32>,
    %c0_i32_8 = arith.constant 0 : i32
    %9 = arith.cmpi eq, %arg2, %c0_i32_8 : i32
    %10 = arith.extui %9 : i1 to i32
    %c0_i32_9 = arith.constant 0 : i32
    %11 = arith.cmpi ne, %10, %c0_i32_9 : i32
    scf.if %11 {
      %c0_10 = arith.constant 0 : index
      %c0_11 = arith.constant 0 : index
      %12 = vector.load %arg7[%c0_10, %c0_11] : memref<16x64xf32, #tpu.memory_space<vmem>>, vector<16x64xf32>
      %c0_12 = arith.constant 0 : index
      %c0_13 = arith.constant 0 : index
      %13 = vector.load %arg5[%c0_12, %c0_13] : memref<1x64xf32, #tpu.memory_space<vmem>>, vector<1x64xf32>
      %14 = vector.broadcast %13 : vector<1x64xf32> to vector<16x64xf32>
      %15 = arith.addf %12, %14 : vector<16x64xf32>
      %cst_14 = arith.constant 0.000000e+00 : f32
      %16 = vector.broadcast %cst_14 : f32 to vector<16x64xf32>
      %17 = arith.maximumf %15, %16 : vector<16x64xf32>
      %18 = arith.truncf %17 : vector<16x64xf32> to vector<16x64xbf16>
      %c0_15 = arith.constant 0 : index
      %c0_16 = arith.constant 0 : index
      %19 = vector.load %arg6[%c0_15, %c0_16] : memref<16x64xbf16, #tpu.memory_space<vmem>>, vector<16x64xbf16>
      tpu.vector_store %arg6[%c0_15, %c0_16], %18 {strides = array<i32>} : memref<16x64xbf16, #tpu.memory_space<vmem>>, vector<16x64xbf16>,
    } else {
    }
    return
  }
  func.func @transform_0(%arg0: i32, %arg1: i32, %arg2: i32) -> (i32, i32) {
    %c0_i32 = arith.constant 0 : i32
    return %arg0, %arg2 : i32, i32
  }
  func.func @transform_1(%arg0: i32, %arg1: i32, %arg2: i32) -> (i32, i32) {
    %c0_i32 = arith.constant 0 : i32
    return %arg2, %arg1 : i32, i32
  }
  func.func @transform_2(%arg0: i32, %arg1: i32, %arg2: i32) -> (i32, i32) {
    %c0_i32 = arith.constant 0 : i32
    %c0_i32_0 = arith.constant 0 : i32
    return %c0_i32, %arg1 : i32, i32
  }
  func.func @transform_3(%arg0: i32, %arg1: i32, %arg2: i32) -> (i32, i32) {
    %c0_i32 = arith.constant 0 : i32
    return %arg0, %arg1 : i32, i32
  }
}

module attributes {stable_mosaic.version = 11 : i64} {
  func.func @_linear_res_ln_kernel(%arg0: i32, %arg1: i32, %arg2: memref<16x64xbf16, #tpu.memory_space<vmem>>, %arg3: memref<64x32xbf16, #tpu.memory_space<vmem>>, %arg4: memref<1x32xf32, #tpu.memory_space<vmem>>, %arg5: memref<16x32xbf16, #tpu.memory_space<vmem>>, %arg6: memref<1x32xf32, #tpu.memory_space<vmem>>, %arg7: memref<1x32xf32, #tpu.memory_space<vmem>>, %arg8: memref<16x32xf32, #tpu.memory_space<vmem>>, %arg9: memref<16x32xf32, #tpu.memory_space<vmem>>) attributes {dimension_semantics = [#tpu.dimension_semantics<parallel>, #tpu.dimension_semantics<arbitrary>], iteration_bounds = array<i64: 1, 1>, scalar_prefetch = 0 : i64, scratch_operands = 1 : i64, tpu.core_type = #tpu.core_type<tc>, window_params = [{transform_indices = @transform_0, window_bounds = array<i64: 16, 64>}, {transform_indices = @transform_1, window_bounds = array<i64: 64, 32>}, {pipeline_mode = #tpu.pipeline_mode<synchronous>, transform_indices = @transform_2, window_bounds = array<i64: 1, 32>}, {transform_indices = @transform_3, window_bounds = array<i64: 16, 32>}, {pipeline_mode = #tpu.pipeline_mode<synchronous>, transform_indices = @transform_4, window_bounds = array<i64: 1, 32>}, {pipeline_mode = #tpu.pipeline_mode<synchronous>, transform_indices = @transform_5, window_bounds = array<i64: 1, 32>}, {transform_indices = @transform_6, window_bounds = array<i64: 16, 32>}]} {
    %c0_i32 = arith.constant 0 : i32
    %0 = arith.cmpi eq, %arg1, %c0_i32 : i32
    %1 = arith.extui %0 : i1 to i32
    %c0_i32_0 = arith.constant 0 : i32
    %2 = arith.cmpi ne, %1, %c0_i32_0 : i32
    scf.if %2 {
      %cst_10 = arith.constant 0.000000e+00 : f32
      %12 = vector.broadcast %cst_10 : f32 to vector<16x32xf32>
      %c0_11 = arith.constant 0 : index
      %c0_12 = arith.constant 0 : index
      %13 = vector.load %arg9[%c0_11, %c0_12] : memref<16x32xf32, #tpu.memory_space<vmem>>, vector<16x32xf32>
      tpu.vector_store %arg9[%c0_11, %c0_12], %12 {strides = array<i32>} : memref<16x32xf32, #tpu.memory_space<vmem>>, vector<16x32xf32>,
    } else {
    }
    %c0 = arith.constant 0 : index
    %c0_1 = arith.constant 0 : index
    %3 = vector.load %arg9[%c0, %c0_1] : memref<16x32xf32, #tpu.memory_space<vmem>>, vector<16x32xf32>
    %c0_2 = arith.constant 0 : index
    %c0_3 = arith.constant 0 : index
    %4 = vector.load %arg2[%c0_2, %c0_3] : memref<16x64xbf16, #tpu.memory_space<vmem>>, vector<16x64xbf16>
    %c0_4 = arith.constant 0 : index
    %c0_5 = arith.constant 0 : index
    %5 = vector.load %arg3[%c0_4, %c0_5] : memref<64x32xbf16, #tpu.memory_space<vmem>>, vector<64x32xbf16>
    %cst = arith.constant dense<0.000000e+00> : vector<16x32xf32>
    %6 = tpu.matmul %4, %5, %cst {dimension_numbers = #tpu.dot_dimension_numbers<[1], [0], [0], [1], [0, 0, 1, 1], [], []>} : vector<16x64xbf16>, vector<64x32xbf16>, vector<16x32xf32> -> vector<16x32xf32>
    %7 = arith.addf %3, %6 : vector<16x32xf32>
    %c0_6 = arith.constant 0 : index
    %c0_7 = arith.constant 0 : index
    %8 = vector.load %arg9[%c0_6, %c0_7] : memref<16x32xf32, #tpu.memory_space<vmem>>, vector<16x32xf32>
    tpu.vector_store %arg9[%c0_6, %c0_7], %7 {strides = array<i32>} : memref<16x32xf32, #tpu.memory_space<vmem>>, vector<16x32xf32>,
    %c0_i32_8 = arith.constant 0 : i32
    %9 = arith.cmpi eq, %arg1, %c0_i32_8 : i32
    %10 = arith.extui %9 : i1 to i32
    %c0_i32_9 = arith.constant 0 : i32
    %11 = arith.cmpi ne, %10, %c0_i32_9 : i32
    scf.if %11 {
      %c0_10 = arith.constant 0 : index
      %c0_11 = arith.constant 0 : index
      %12 = vector.load %arg9[%c0_10, %c0_11] : memref<16x32xf32, #tpu.memory_space<vmem>>, vector<16x32xf32>
      %c0_12 = arith.constant 0 : index
      %c0_13 = arith.constant 0 : index
      %13 = vector.load %arg4[%c0_12, %c0_13] : memref<1x32xf32, #tpu.memory_space<vmem>>, vector<1x32xf32>
      %14 = vector.broadcast %13 : vector<1x32xf32> to vector<16x32xf32>
      %15 = arith.addf %12, %14 : vector<16x32xf32>
      %c0_14 = arith.constant 0 : index
      %c0_15 = arith.constant 0 : index
      %16 = vector.load %arg5[%c0_14, %c0_15] : memref<16x32xbf16, #tpu.memory_space<vmem>>, vector<16x32xbf16>
      %17 = arith.extf %16 : vector<16x32xbf16> to vector<16x32xf32>
      %18 = arith.addf %15, %17 : vector<16x32xf32>
      %cst_16 = arith.constant dense<0.000000e+00> : vector<16xf32>
      %19 = vector.multi_reduction <add>, %18, %cst_16 [1] : vector<16x32xf32> to vector<16xf32>
      %20 = vector.shape_cast %19 : vector<16xf32> to vector<16x1xf32>
      %cst_17 = arith.constant 3.200000e+01 : f32
      %21 = vector.broadcast %cst_17 : f32 to vector<16x1xf32>
      %22 = arith.divf %20, %21 : vector<16x1xf32>
      %23 = vector.broadcast %22 : vector<16x1xf32> to vector<16x32xf32>
      %24 = arith.subf %18, %23 : vector<16x32xf32>
      %25 = arith.mulf %24, %24 : vector<16x32xf32>
      %cst_18 = arith.constant dense<0.000000e+00> : vector<16xf32>
      %26 = vector.multi_reduction <add>, %25, %cst_18 [1] : vector<16x32xf32> to vector<16xf32>
      %27 = vector.shape_cast %26 : vector<16xf32> to vector<16x1xf32>
      %cst_19 = arith.constant 3.200000e+01 : f32
      %28 = vector.broadcast %cst_19 : f32 to vector<16x1xf32>
      %29 = arith.divf %27, %28 : vector<16x1xf32>
      %cst_20 = arith.constant 9.99999974E-6 : f32
      %30 = vector.broadcast %cst_20 : f32 to vector<16x1xf32>
      %31 = arith.addf %29, %30 : vector<16x1xf32>
      %32 = math.rsqrt %31 : vector<16x1xf32>
      %33 = vector.broadcast %32 : vector<16x1xf32> to vector<16x32xf32>
      %34 = arith.mulf %24, %33 : vector<16x32xf32>
      %c0_21 = arith.constant 0 : index
      %c0_22 = arith.constant 0 : index
      %35 = vector.load %arg6[%c0_21, %c0_22] : memref<1x32xf32, #tpu.memory_space<vmem>>, vector<1x32xf32>
      %36 = vector.broadcast %35 : vector<1x32xf32> to vector<16x32xf32>
      %37 = arith.mulf %34, %36 : vector<16x32xf32>
      %c0_23 = arith.constant 0 : index
      %c0_24 = arith.constant 0 : index
      %38 = vector.load %arg7[%c0_23, %c0_24] : memref<1x32xf32, #tpu.memory_space<vmem>>, vector<1x32xf32>
      %39 = vector.broadcast %38 : vector<1x32xf32> to vector<16x32xf32>
      %40 = arith.addf %37, %39 : vector<16x32xf32>
      %c0_25 = arith.constant 0 : index
      %c0_26 = arith.constant 0 : index
      %41 = vector.load %arg8[%c0_25, %c0_26] : memref<16x32xf32, #tpu.memory_space<vmem>>, vector<16x32xf32>
      tpu.vector_store %arg8[%c0_25, %c0_26], %40 {strides = array<i32>} : memref<16x32xf32, #tpu.memory_space<vmem>>, vector<16x32xf32>,
    } else {
    }
    return
  }
  func.func @transform_0(%arg0: i32, %arg1: i32) -> (i32, i32) {
    %c0_i32 = arith.constant 0 : i32
    return %arg0, %arg1 : i32, i32
  }
  func.func @transform_1(%arg0: i32, %arg1: i32) -> (i32, i32) {
    %c0_i32 = arith.constant 0 : i32
    %c0_i32_0 = arith.constant 0 : i32
    return %arg1, %c0_i32 : i32, i32
  }
  func.func @transform_2(%arg0: i32, %arg1: i32) -> (i32, i32) {
    %c0_i32 = arith.constant 0 : i32
    %c0_i32_0 = arith.constant 0 : i32
    %c0_i32_1 = arith.constant 0 : i32
    return %c0_i32, %c0_i32_0 : i32, i32
  }
  func.func @transform_3(%arg0: i32, %arg1: i32) -> (i32, i32) {
    %c0_i32 = arith.constant 0 : i32
    %c0_i32_0 = arith.constant 0 : i32
    return %arg0, %c0_i32 : i32, i32
  }
  func.func @transform_4(%arg0: i32, %arg1: i32) -> (i32, i32) {
    %c0_i32 = arith.constant 0 : i32
    %c0_i32_0 = arith.constant 0 : i32
    %c0_i32_1 = arith.constant 0 : i32
    return %c0_i32, %c0_i32_0 : i32, i32
  }
  func.func @transform_5(%arg0: i32, %arg1: i32) -> (i32, i32) {
    %c0_i32 = arith.constant 0 : i32
    %c0_i32_0 = arith.constant 0 : i32
    %c0_i32_1 = arith.constant 0 : i32
    return %c0_i32, %c0_i32_0 : i32, i32
  }
  func.func @transform_6(%arg0: i32, %arg1: i32) -> (i32, i32) {
    %c0_i32 = arith.constant 0 : i32
    %c0_i32_0 = arith.constant 0 : i32
    return %arg0, %c0_i32 : i32, i32
  }
}

</mosaic_0001>

<bundles_post_ra>
// kernel: nstack2seq_decoder_layer_forward.9
= control target key start
LH: loop header
LB: loop body
LE: loop exit
PB: predicated region body
PF: predicated region fallthrough
CT: control target
= control target key end

     0   :  { %vm19_vm0 = vcmask 785408   ;;  %v108_v1 = vmov 0.0   ;;  %vm47_vm1 = vcmask 261120   ;;  %vm83_vm2 = vcmask 781312   ;;  %s151_s1 = inlined_call_operand.vmem [shape: bf16[32,96], index: 1, kind: input, shape index: {}]   ;;  %s152_s2 = inlined_call_operand.vmem [shape: f32[1,96], index: 2, kind: input, shape index: {}]   ;;  %s153_s0 = inlined_call_operand.vmem [shape: bf16[16,32], index: 0, kind: input, shape index: {}]   ;;  %s154_s3 = inlined_call_operand.vmem [shape: bf16[16,96], index: 3, kind: output, shape index: {}]  }
   0x1   :  { %v105_v0 = vld [vmem:[%s151_s1 + $0x8] sm:$0xff]  ;;  %20 = vst.msk [vmem:[#allocation2] sm:$0xff] %vm19_vm0, %v108_v1  ;;  %v104_v2 = vld [vmem:[%s151_s1] sm:$0xff] }
   0x2   :  { %21 = vst.msk [vmem:[#allocation2 + $0x8] sm:$0xff] %vm19_vm0, %v108_v1  ;;  %57 = vmatpush.bf16.msra.mxu0 %v105_v0  ;;  %v103_v3 = vld [vmem:[%s153_s0] sm:$0xff] }
   0x3   :  { %v107_v8 = vld [vmem:[%s152_s2] ss:$0 sm:$0xff] }
   0x6   :  { %58 = vmatpush.bf16.msra.mxu0 %v104_v2 }
   0x8   :  { %v22_v4 = vld [vmem:[#allocation2] sm:$0xff] }
   0x9   :  { %102 = vmatmul.msk.bf16.vlgmr.msra.gmra.mxu0 %vm47_vm1, %v103_v3  ;;  %v23_v7 = vld [vmem:[#allocation2 + $0x8] sm:$0xff] }
  0x86   :  { %v60_v5 = vpop.f32.mrf.mxu0 }
  0x87   :  { %v65_v6 = vadd.f32 %v60_v5, %v22_v4 }
  0x89   :  { %68 = vst.msk [vmem:[#allocation2] sm:$0xff] %vm19_vm0, %v65_v6 }
  0x8e   :  { %v62_v9 = vpop.f32.mrf.mxu0 }
  0x8f   :  { %v66_v10 = vadd.f32 %v62_v9, %v23_v7 }
  0x90   :  { %v73_v11 = vld [vmem:[#allocation2] sm:$0xff] }
  0x91   :  { %v79_v12 = vadd.f32 %v107_v8, %v73_v11  ;;  %69 = vst.msk [vmem:[#allocation2 + $0x8] sm:$0xff] %vm19_vm0, %v66_v10 }
  0x93   :  { %v81_v13 = vpack.c.bf16 %v79_v12, %v79_v12 }
  0x95   :  { %84 = vst.msk [vmem:[%s154_s3] sm:$0xf] %vm83_vm2, %v81_v13 }
  0x98   :  { %v74_v14 = vld [vmem:[#allocation2 + $0x8] sm:$0xff] }
  0x99   :  { %v80_v15 = vadd.f32 %v107_v8, %v74_v14 }
  0x9b   :  { %v82_v16 = vpack.c.bf16 %v80_v15, %v80_v15 }
  0x9d   :  { %85 = vst.msk [vmem:[%s154_s3 + $0x4] sm:$0xf] %vm83_vm2, %v82_v16 }

// kernel: nstack2seq_decoder_layer_forward.12
= control target key start
LH: loop header
LB: loop body
LE: loop exit
PB: predicated region body
PF: predicated region fallthrough
CT: control target
= control target key end

     0   :  { %vm19_vm0 = vcmask 261120   ;;  %v107_v1 = vmov 0.0   ;;  %vm82_vm1 = vcmask 257024   ;;  %s151_s1 = inlined_call_operand.vmem [shape: bf16[32,32], index: 1, kind: input, shape index: {}]   ;;  %s152_s2 = inlined_call_operand.vmem [shape: f32[1,32], index: 2, kind: input, shape index: {}]   ;;  %s153_s0 = inlined_call_operand.vmem [shape: bf16[16,32], index: 0, kind: input, shape index: {}]   ;;  %s154_s3 = inlined_call_operand.vmem [shape: bf16[16,32], index: 3, kind: output, shape index: {}]  }
   0x1   :  { %v104_v0 = vld [vmem:[%s151_s1 + $0x8] sm:$0xff]  ;;  %20 = vst.msk [vmem:[#allocation2] sm:$0xff] %vm19_vm0, %v107_v1  ;;  %v103_v2 = vld [vmem:[%s151_s1] sm:$0xff] }
   0x2   :  { %21 = vst.msk [vmem:[#allocation2 + $0x8] sm:$0xff] %vm19_vm0, %v107_v1  ;;  %57 = vmatpush.bf16.msra.mxu0 %v104_v0  ;;  %v102_v3 = vld [vmem:[%s153_s0] sm:$0xff] }
   0x3   :  { %v106_v8 = vld [vmem:[%s152_s2] ss:$0 sm:$0xff] }
   0x6   :  { %58 = vmatpush.bf16.msra.mxu0 %v103_v2 }
   0x8   :  { %v22_v4 = vld [vmem:[#allocation2] sm:$0xff] }
   0x9   :  { %101 = vmatmul.msk.bf16.vlgmr.msra.gmra.mxu0 %vm19_vm0, %v102_v3  ;;  %v23_v7 = vld [vmem:[#allocation2 + $0x8] sm:$0xff] }
  0x86   :  { %v60_v5 = vpop.f32.mrf.mxu0 }
  0x87   :  { %v65_v6 = vadd.f32 %v60_v5, %v22_v4 }
  0x89   :  { %67 = vst.msk [vmem:[#allocation2] sm:$0xff] %vm19_vm0, %v65_v6 }
  0x8e   :  { %v62_v9 = vpop.f32.mrf.mxu0 }
  0x8f   :  { %v66_v10 = vadd.f32 %v62_v9, %v23_v7 }
  0x90   :  { %v72_v11 = vld [vmem:[#allocation2] sm:$0xff] }
  0x91   :  { %v78_v12 = vadd.f32 %v106_v8, %v72_v11  ;;  %68 = vst.msk [vmem:[#allocation2 + $0x8] sm:$0xff] %vm19_vm0, %v66_v10 }
  0x93   :  { %v80_v13 = vpack.c.bf16 %v78_v12, %v78_v12 }
  0x95   :  { %83 = vst.msk [vmem:[%s154_s3] sm:$0xf] %vm82_vm1, %v80_v13 }
  0x98   :  { %v73_v14 = vld [vmem:[#allocation2 + $0x8] sm:$0xff] }
  0x99   :  { %v79_v15 = vadd.f32 %v106_v8, %v73_v14 }
  0x9b   :  { %v81_v16 = vpack.c.bf16 %v79_v15, %v79_v15 }
  0x9d   :  { %84 = vst.msk [vmem:[%s154_s3 + $0x4] sm:$0xf] %vm82_vm1, %v81_v16 }

// kernel: nstack2seq_decoder_layer_forward.10
= control target key start
LH: loop header
LB: loop body
LE: loop exit
PB: predicated region body
PF: predicated region fallthrough
CT: control target
= control target key end

     0   :  { %s732_s12 = smov 0   ;;  %s734_s13 = smov 0   ;;  %s806_s0 = inlined_call_operand.vmem [shape: bf16[3,2,4,8,8], index: 0, kind: input, shape index: {}, may-alias: {0,1,2}]   ;;  %s807_s1 = inlined_call_operand.vmem [shape: bf16[3,2,4,8,8], index: 1, kind: input, shape index: {}, may-alias: {0,1,2}]   ;;  %s808_s2 = inlined_call_operand.vmem [shape: bf16[3,2,4,8,8], index: 2, kind: input, shape index: {}, may-alias: {0,1,2}]   ;;  %s809_s3 = inlined_call_operand.vmem [shape: bf16[2,4,8,8], index: 3, kind: output, shape index: {}]  }
   0x1   :  { %s736_s14 = smov 0   ;;  %s738_s15 = smov 0  }
   0x2   :  { %s740_s16 = smov 0  }
   0x3 LB: > { %s35_s17 = sadd.s32 1, %s699_s14  ;;  %s39_s18 = sadd.s32 1, %s703_s15  ;;  %s707_s16 = sphi %s740_s16, %s13_s16   ;;  %s703_s15 = sphi %s738_s15, %s813_s15   ;;  %s699_s14 = sphi %s736_s14, %s812_s14   ;;  %s695_s13 = sphi %s734_s13, %s811_s13   ;;  %s691_s12 = sphi %s732_s12, %s810_s12  }
   0x4   : > { %p37_p0 = scmp.ge.s32.totalorder %s35_s17, 4  ;;  %p602_p1 = scmp.ge.s32.totalorder %s707_s16, 1 }
   0x5   : > { %p219_p2 = scmp.lt.s32.totalorder %s707_s16, 9 }
   0x6   : > { %s815_s17 = smov (%p37_p0, %s35_s17), 0  ;;  %s817_s18 = smov (!%p37_p0, %s39_s18), %s703_s15 }
   0x7   : > { %p220_p3 = pnand %p602_p1, %p219_p2  ;;  %p41_p4 = scmp.ge.s32.totalorder %s817_s18, 2 }
   0x8   : > { %p279_p5 = scmp.lt.s32.totalorder (!%p220_p3), %s695_s13, 1  ;;  %p281_p6 = scmp.lt.s32.totalorder (!%p220_p3), %s691_s12, 3 }
   0x9   : > { %s819_s18 = smov (%p41_p4, %s817_s18), 0  ;;  %223 = sbr.rel (%p220_p3) target bundleno = 630 (0x276), region = 32 }
   0xe   : > { %s821_s13 = smov (!%p279_p5, %s695_s13), 1  ;;  %s823_s12 = smov (!%p281_p6, %s691_s12), 3  ;;  %vm333_vm0 = vcmask 64512   ;;  %vm330_vm1 = vcmask 7168   ;;  %v709_v3 = vmov -inf   ;;  %v364_v4 = vlaneseq }
   0xf   : > { %s603_s19 = sshll.u32 %s821_s13, 2  ;;  %331 = vst.msk [vmem:[#allocation2] sm:$0xff] %vm330_vm1, %v709_v3  ;;  %v710_v11 = vmov 0   ;;  %v711_v12 = vmov 0.0   ;;  %vm410_vm3 = vcmask 1043456   ;;  %vm443_vm4 = vcmask 60416  }
  0x10   : > { %s287_s20 = sadd.s32 %s603_s19, %s823_s12  ;;  %v365_v5 = vshrl.u32 %v364_v4, 7  ;;  %v369_v6 = vand.u32 127, %v364_v4  ;;  %660 = vset.pattern.permute.xlu0 %v710_v11  ;;  %661 = vset.pattern.permute.xlu1 %v710_v11  ;;  %332 = vst.msk [vmem:[#allocation3] sm:$0xff] %vm330_vm1, %v711_v12 }
  0x11   : > { %s762_s21 = sshll.u32 %s287_s20, 2  ;;  %662 = vset.pattern.permute.xlu2 %v710_v11  ;;  %334 = vst.msk [vmem:[#allocation4] sm:$0xff] %vm333_vm0, %v711_v12 }
  0x12   : > { %s526_s24 = scalar_lea.vmem %s807_s1, %s762_s21  ;;  %s289_s27 = scalar_lea.vmem %s806_s0, %s762_s21  ;;  %vm372_vm2 = vcmp.gt.s32.totalorder %v369_v6, %v365_v5 }
  0x13   : > { %v611_v0 = vld [vmem:[%s526_s24 + $0x20] sm:$0xf]  ;;  %s532_s30 = scalar_lea.vmem %s808_s2, %s762_s21  ;;  %s324_s6 = scalar_lea.vmem %s809_s3, %s762_s21 }
  0x14   : > { %v349_v1 = vsel %vm333_vm0, %v611_v0, 0  ;;  %v342_v2 = vld [vmem:[%s289_s27] sm:$0xf] }
  0x15   : > { %358 = vmatpush.bf16.xpose.msra.mxu0 %v349_v1  ;;  %v613_v17 = vld [vmem:[%s532_s30 + $0x40] sm:$0xf] }
  0x16   : > { %v374_v13 = vld [vmem:[#allocation2] sm:$0xff]  ;;  %v412_v18 = vsel %vm410_vm3, %v613_v17, 0 }
  0x17   : > { %421 = vmatpush.bf16.msra.mxu1 %v412_v18  ;;  %v390_v27 = vld [vmem:[#allocation3] sm:$0xff] }
  0x18   : > { %v398_v35 = vld [vmem:[#allocation4] sm:$0xff] }
  0x1c   : > { %612 = vmatmul.msk.bf16.vlgmr.msra.gmra.mxu0 %vm333_vm0, %v342_v2 }
  0x99   : > { %v360_v7 = vpop.f32.mrf.mxu0 }
  0x9a   : > { %v373_v8 = vsel %vm372_vm2, -1e+09, %v360_v7 }
  0x9b   : > { %v375_v9 = vsel %vm333_vm0, %v373_v8, -inf }
  0x9c   : > { %376 = vmax.xlane.f32.xlu0 %v375_v9 }
  0xa1   : > { %v362_v10 = vpop.f32.mrf.mxu0 }
 0x10f   : > { %v377_v14 = vpop.xlane.xlu0 %376 }
 0x110   : > { %v378_v15 = vmax.f32 %v374_v13, %v377_v14 }
 0x112   : > { %v379_v16 = vsub.f32 %v374_v13, %v378_v15  ;;  %429 = vst.msk [vmem:[#allocation2] sm:$0xff] %vm330_vm1, %v378_v15  ;;  %384 = vperm.xlu0 %660, %v378_v15  }
 0x114   : > { %v380_v25 = vmul.f32 1.442695, %v379_v16 }
 0x184   : > { %v385_v19 = vpop.permute.xlu0 %384 }
 0x185   : > { %v387_v20 = vsub.f32 %v373_v8, %v385_v19 }
 0x187   : > { %v388_v21 = vmul.f32 1.442695, %v387_v20 }
 0x189   : > { %663 = vpow2.f32 %v388_v21 }
 0x18a   : > { %665 = vpow2.f32 %v380_v25 }
 0x18f   : > { %v664_v22 = vpop.eup %663 }
 0x190   : > { %v392_v23 = vsel %vm333_vm0, %v664_v22, 0.0  ;;  %v405_v24 = vpack.c.bf16 %v664_v22, %v664_v22  ;;  %v666_v26 = vpop.eup %665 }
 0x191   : > { %393 = vadd.xlane.f32.xlu1 %v392_v23  ;;  %v391_v28 = vmul.f32 %v666_v26, %v390_v27 }
 0x192   : > { %614 = vmatmul.msk.bf16.vlgmr.msra.gmra.mxu1 %vm333_vm0, %v405_v24 }
 0x1aa   : > { %401 = vperm.xlu1 %661, %v666_v26  }
 0x204   : > { %v394_v29 = vpop.xlane.xlu1 %393 }
 0x205   : > { %v395_v30 = vadd.f32 %v394_v29, %v391_v28 }
 0x207   : > { %397 = vst.msk [vmem:[#allocation3] sm:$0xff] %vm330_vm1, %v395_v30 }
 0x20e   : > { %v433_v31 = vld [vmem:[#allocation3] sm:$0xff] }
 0x20f   : > { %v423_v32 = vpop.f32.mrf.mxu1  ;;  %667 = vrcp.f32 %v433_v31 }
 0x215   : > { %v668_v33 = vpop.eup %667 }
 0x216   : > { %438 = vperm.xlu2 %662, %v668_v33  }
 0x217   : > { %v425_v34 = vpop.f32.mrf.mxu1 }
 0x21c   : > { %v402_v36 = vpop.permute.xlu1 %401 }
 0x21d   : > { %v404_v37 = vmul.f32 %v402_v36, %v398_v35 }
 0x21f   : > { %v427_v38 = vadd.f32 %v423_v32, %v404_v37 }
 0x221   : > { %428 = vst.msk [vmem:[#allocation4] sm:$0xff] %vm333_vm0, %v427_v38 }
 0x228   : > { %v435_v39 = vld [vmem:[#allocation4] sm:$0xff] }
 0x270   : > { %v439_v40 = vpop.permute.xlu2 %438 }
 0x271   : > { %v441_v41 = vmul.f32 %v439_v40, %v435_v39 }
 0x273   : > { %v442_v42 = vpack.c.bf16 %v441_v41, %v441_v41 }
 0x275   : > { %444 = vst.msk [vmem:[%s324_s6] sm:$0xf] %vm443_vm4, %v442_v42 }
 0x276 PF: > { %s13_s16 = sadd.s32 1, %s707_s16   ;;  %s810_s12 = smov %s699_s14 }
 0x277   : > { %p10_p7 = scmp.ge.s32.totalorder %s13_s16, 10   ;;  %s811_s13 = smov %s703_s15 }
 0x278   : > { %s812_s14 = smov %s815_s17  ;;  %s813_s15 = smov %s819_s18 }
 0x279   :  { %12 = sbr.rel (!%p10_p7) target bundleno = 3 (0x3), region = 80 }

// kernel: nstack2seq_decoder_layer_forward.11
= control target key start
LH: loop header
LB: loop body
LE: loop exit
PB: predicated region body
PF: predicated region fallthrough
CT: control target
= control target key end

     0   :  { %vm28_vm0 = vcmask 261120   ;;  %v198_v1 = vmov 0.0   ;;  %v199_v22 = vmov 32.0   ;;  %vm160_vm6 = vcmask 257024   ;;  %s271_s1 = inlined_call_operand.vmem [shape: bf16[32,32], index: 1, kind: input, shape index: {}]   ;;  %s272_s0 = inlined_call_operand.vmem [shape: bf16[16,32], index: 0, kind: input, shape index: {}]   ;;  %s273_s2 = inlined_call_operand.vmem [shape: f32[1,32], index: 2, kind: input, shape index: {}]   ;;  %s274_s3 = inlined_call_operand.vmem [shape: bf16[16,32], index: 3, kind: input, shape index: {}]   ;;  %s275_s4 = inlined_call_operand.vmem [shape: f32[1,32], index: 4, kind: input, shape index: {}]   ;;  %s276_s5 = inlined_call_operand.vmem [shape: f32[1,32], index: 5, kind: input, shape index: {}]   ;;  %s277_s6 = inlined_call_operand.vmem [shape: bf16[16,32], index: 6, kind: output, shape index: {}]  }
   0x1   :  { %v182_v0 = vld [vmem:[%s271_s1 + $0x8] sm:$0xff]  ;;  %29 = vst.msk [vmem:[#allocation2] sm:$0xff] %vm28_vm0, %v198_v1  ;;  %v181_v2 = vld [vmem:[%s271_s1] sm:$0xff]  ;;  %192 = vrcp.f32 %v199_v22 }
   0x2   :  { %30 = vst.msk [vmem:[#allocation2 + $0x8] sm:$0xff] %vm28_vm0, %v198_v1  ;;  %66 = vmatpush.bf16.msra.mxu0 %v182_v0  ;;  %v180_v3 = vld [vmem:[%s272_s0] sm:$0xff] }
   0x3   :  { %v184_v8 = vld [vmem:[%s274_s3] sm:$0xff]  }
   0x4   :  { %v189_v9 = vld [vmem:[%s273_s2] ss:$0 sm:$0xff]  ;;  %v185_v12 = vunpack.c.l.bf16 %v184_v8  ;;  %v186_v17 = vunpack.c.h.bf16 %v184_v8 }
   0x5   :  { %v190_v53 = vld [vmem:[%s275_s4] ss:$0 sm:$0xff] }
   0x6   :  { %67 = vmatpush.bf16.msra.mxu0 %v181_v2  ;;  %v191_v56 = vld [vmem:[%s276_s5] ss:$0 sm:$0xff] }
   0x7   :  { %v193_v23 = vpop.eup %192 }
   0x8   :  { %v31_v4 = vld [vmem:[#allocation2] sm:$0xff]  ;;  %v102_v24 = vmul.f32 32.0, %v193_v23  ;;  %vm106_vm1 = vweird.f32 %v193_v23 }
   0x9   :  { %179 = vmatmul.msk.bf16.vlgmr.msra.gmra.mxu0 %vm28_vm0, %v180_v3  ;;  %v32_v7 = vld [vmem:[#allocation2 + $0x8] sm:$0xff] }
   0xa   :  { %v103_v25 = vsub.f32 1.0, %v102_v24 }
   0xc   :  { %v104_v26 = vmul.f32 %v193_v23, %v103_v25 }
   0xe   :  { %v105_v27 = vadd.f32 %v193_v23, %v104_v26 }
  0x10   :  { %v107_v28 = vsel %vm106_vm1, %v193_v23, %v105_v27 }
  0x86   :  { %v69_v5 = vpop.f32.mrf.mxu0 }
  0x87   :  { %v74_v6 = vadd.f32 %v69_v5, %v31_v4 }
  0x89   :  { %76 = vst.msk [vmem:[#allocation2] sm:$0xff] %vm28_vm0, %v74_v6 }
  0x8e   :  { %v71_v10 = vpop.f32.mrf.mxu0 }
  0x8f   :  { %v75_v11 = vadd.f32 %v71_v10, %v32_v7 }
  0x90   :  { %v81_v13 = vld [vmem:[#allocation2] sm:$0xff] }
  0x91   :  { %77 = vst.msk [vmem:[#allocation2 + $0x8] sm:$0xff] %vm28_vm0, %v75_v11  ;;  %v87_v14 = vadd.f32 %v189_v9, %v81_v13 }
  0x93   :  { %v93_v15 = vadd.f32 %v185_v12, %v87_v14 }
  0x95   :  { %v95_v16 = vsel %vm28_vm0, %v93_v15, 0.0 }
  0x96   :  { %96 = vadd.xlane.f32.xlu0 %v95_v16 }
  0x98   :  { %v82_v18 = vld [vmem:[#allocation2 + $0x8] sm:$0xff] }
  0x99   :  { %v88_v19 = vadd.f32 %v189_v9, %v82_v18 }
  0x9b   :  { %v94_v20 = vadd.f32 %v186_v17, %v88_v19 }
  0x9d   :  { %v98_v21 = vsel %vm28_vm0, %v94_v20, 0.0 }
  0x9e   :  { %99 = vadd.xlane.f32.xlu0 %v98_v21 }
 0x109   :  { %v97_v29 = vpop.xlane.xlu0 %96 }
 0x10a   :  { %v108_v30 = vmul.f32 %v107_v28, %v97_v29 }
 0x10c   :  { %v110_v31 = vsub.f32 %v93_v15, %v108_v30 }
 0x10e   :  { %v112_v32 = vmul.f32 %v110_v31, %v110_v31 }
 0x110   :  { %v114_v33 = vsel %vm28_vm0, %v112_v32, 0.0 }
 0x111   :  { %115 = vadd.xlane.f32.xlu1 %v114_v33  ;;  %v100_v34 = vpop.xlane.xlu0 %99 }
 0x112   :  { %v109_v35 = vmul.f32 %v107_v28, %v100_v34 }
 0x114   :  { %v111_v36 = vsub.f32 %v94_v20, %v109_v35 }
 0x116   :  { %v113_v37 = vmul.f32 %v111_v36, %v111_v36 }
 0x118   :  { %v117_v38 = vsel %vm28_vm0, %v113_v37, 0.0 }
 0x119   :  { %118 = vadd.xlane.f32.xlu1 %v117_v38 }
 0x184   :  { %v116_v39 = vpop.xlane.xlu1 %115 }
 0x185   :  { %v120_v40 = vmul.f32 %v116_v39, %v107_v28 }
 0x187   :  { %v122_v41 = vadd.f32 1e-05, %v120_v40 }
 0x189   :  { %194 = vrsqrt.f32 %v122_v41  ;;  %vm130_vm3 = vweird.f32 %v122_v41 }
 0x18c   :  { %v119_v42 = vpop.xlane.xlu1 %118 }
 0x18d   :  { %v121_v43 = vmul.f32 %v119_v42, %v107_v28 }
 0x18f   :  { %v195_v44 = vpop.eup %194  ;;  %v123_v45 = vadd.f32 1e-05, %v121_v43 }
 0x190   :  { %v125_v46 = vmul.f32 %v195_v44, %v122_v41  ;;  %vm131_vm2 = vweird.f32 %v195_v44 }
 0x191   :  { %196 = vrsqrt.f32 %v123_v45  ;;  %vm132_vm4 = vmor %vm130_vm3, %vm131_vm2  ;;  %vm140_vm7 = vweird.f32 %v123_v45 }
 0x192   :  { %v126_v47 = vmul.f32 %v195_v44, %v125_v46 }
 0x194   :  { %v127_v48 = vmul.f32 0.5, %v126_v47 }
 0x196   :  { %v128_v49 = vsub.f32 1.5, %v127_v48 }
 0x197   :  { %v197_v50 = vpop.eup %196 }
 0x198   :  { %v129_v51 = vmul.f32 %v195_v44, %v128_v49  ;;  %v135_v52 = vmul.f32 %v197_v50, %v123_v45  ;;  %vm141_vm5 = vweird.f32 %v197_v50 }
 0x199   :  { %vm142_vm8 = vmor %vm140_vm7, %vm141_vm5 }
 0x19a   :  { %v133_v54 = vsel %vm132_vm4, %v195_v44, %v129_v51  ;;  %v136_v55 = vmul.f32 %v197_v50, %v135_v52 }
 0x19b   :  { %v144_v57 = vmul.f32 %v133_v54, %v110_v31 }
 0x19c   :  { %v137_v58 = vmul.f32 0.5, %v136_v55 }
 0x19d   :  { %v150_v59 = vmul.f32 %v190_v53, %v144_v57 }
 0x19e   :  { %v138_v60 = vsub.f32 1.5, %v137_v58 }
 0x19f   :  { %v156_v61 = vadd.f32 %v191_v56, %v150_v59 }
 0x1a0   :  { %v139_v62 = vmul.f32 %v197_v50, %v138_v60 }
 0x1a1   :  { %v158_v63 = vpack.c.bf16 %v156_v61, %v156_v61 }
 0x1a2   :  { %v143_v0 = vsel %vm142_vm8, %v197_v50, %v139_v62 }
 0x1a3   :  { %161 = vst.msk [vmem:[%s277_s6] sm:$0xf] %vm160_vm6, %v158_v63  ;;  %v145_v1 = vmul.f32 %v143_v0, %v111_v36 }
 0x1a5   :  { %v151_v2 = vmul.f32 %v190_v53, %v145_v1 }
 0x1a7   :  { %v157_v3 = vadd.f32 %v191_v56, %v151_v2 }
 0x1a9   :  { %v159_v4 = vpack.c.bf16 %v157_v3, %v157_v3 }
 0x1ab   :  { %162 = vst.msk [vmem:[%s277_s6 + $0x4] sm:$0xf] %vm160_vm6, %v159_v4 }

// kernel: nstack2seq_decoder_layer_forward.13
= control target key start
LH: loop header
LB: loop body
LE: loop exit
PB: predicated region body
PF: predicated region fallthrough
CT: control target
= control target key end

     0   :  { %vm19_vm0 = vcmask 523264   ;;  %v132_v1 = vmov 0.0   ;;  %vm54_vm1 = vcmask 261120   ;;  %vm22_vm2 = vcmask 519168   ;;  %s185_s1 = inlined_call_operand.vmem [shape: bf16[32,64], index: 1, kind: input, shape index: {}]   ;;  %s186_s0 = inlined_call_operand.vmem [shape: bf16[20,32], index: 0, kind: input, shape index: {}]   ;;  %s187_s2 = inlined_call_operand.vmem [shape: f32[1,64], index: 2, kind: input, shape index: {}]   ;;  %s188_s3 = inlined_call_operand.vmem [shape: bf16[20,64], index: 3, kind: output, shape index: {}]  }
   0x1   :  { %v127_v0 = vld [vmem:[%s185_s1 + $0x8] sm:$0xff]  ;;  %20 = vst.msk [vmem:[#allocation2] sm:$0xff] %vm19_vm0, %v132_v1  ;;  %v126_v3 = vld [vmem:[%s185_s1] sm:$0xff]  ;;  %vm105_vm3 = vcmask 517120  }
   0x2   :  { %v29_v2 = vld [vmem:[%s186_s0 + $0x8] sm:$0x3]  ;;  %21 = vst.msk [vmem:[#allocation2 + $0x8] sm:$0xff] %vm19_vm0, %v132_v1  ;;  %67 = vmatpush.bf16.msra.mxu0 %v127_v0  ;;  %128 = vmatpush.bf16.msra.mxu1 %v127_v0  ;;  %v125_v5 = vld [vmem:[%s186_s0] sm:$0xff] }
   0x3   :  { %v39_v4 = vunpack.c.l.b16 %v29_v2  ;;  %23 = vst.msk [vmem:[#allocation2 + $0x10] sm:$0xf] %vm22_vm2, %v132_v1  ;;  %v131_v14 = vld [vmem:[%s187_s2] ss:$0 sm:$0xff] }
   0x5   :  { %v41_v6 = vpack.c.b16 %v39_v4, %v39_v4 }
   0x6   :  { %68 = vmatpush.bf16.msra.mxu0 %v126_v3  ;;  %129 = vmatpush.bf16.msra.mxu1 %v126_v3 }
   0x8   :  { %v24_v7 = vld [vmem:[#allocation2] sm:$0xff] }
   0x9   :  { %123 = vmatmul.msk.bf16.vlgmr.msra.gmra.mxu0 %vm54_vm1, %v125_v5  ;;  %124 = vmatmul.msk.bf16.vlgmr.msra.gmra.mxu1 %vm54_vm1, %v41_v6  ;;  %v25_v13 = vld [vmem:[#allocation2 + $0x8] sm:$0xff] }
   0xa   :  { %v26_v8 = vld [vmem:[#allocation2 + $0x10] sm:$0xf] }
  0x86   :  { %v70_v9 = vpop.f32.mrf.mxu0  ;;  %v75_v10 = vpop.f32.mrf.mxu1 }
  0x87   :  { %v79_v11 = vadd.f32 %v70_v9, %v24_v7  ;;  %v81_v12 = vadd.f32 %v75_v10, %v26_v8 }
  0x89   :  { %83 = vst.msk [vmem:[#allocation2] sm:$0xff] %vm19_vm0, %v79_v11 }
  0x8a   :  { %86 = vst.msk [vmem:[#allocation2 + $0x10] sm:$0xf] %vm22_vm2, %v81_v12 }
  0x8e   :  { %v72_v15 = vpop.f32.mrf.mxu0  ;;  %v77_v16 = vpop.f32.mrf.mxu1 }
  0x8f   :  { %v80_v17 = vadd.f32 %v72_v15, %v25_v13 }
  0x90   :  { %v90_v18 = vld [vmem:[#allocation2] sm:$0xff] }
  0x91   :  { %v92_v19 = vld [vmem:[#allocation2 + $0x10] sm:$0xf]  ;;  %v97_v20 = vadd.f32 %v131_v14, %v90_v18  ;;  %84 = vst.msk [vmem:[#allocation2 + $0x8] sm:$0xff] %vm19_vm0, %v80_v17 }
  0x92   :  { %v99_v21 = vadd.f32 %v131_v14, %v92_v19 }
  0x93   :  { %v100_v22 = vpack.c.bf16 %v97_v20, %v97_v20 }
  0x94   :  { %v102_v23 = vpack.c.bf16 %v99_v21, %v99_v21 }
  0x95   :  { %103 = vst.msk [vmem:[%s188_s3] sm:$0xf] %vm22_vm2, %v100_v22 }
  0x96   :  { %106 = vst.msk [vmem:[%s188_s3 + $0x8] sm:$0x3] %vm105_vm3, %v102_v23 }
  0x98   :  { %v91_v24 = vld [vmem:[#allocation2 + $0x8] sm:$0xff] }
  0x99   :  { %v98_v25 = vadd.f32 %v131_v14, %v91_v24 }
  0x9b   :  { %v101_v26 = vpack.c.bf16 %v98_v25, %v98_v25 }
  0x9d   :  { %104 = vst.msk [vmem:[%s188_s3 + $0x4] sm:$0xf] %vm22_vm2, %v101_v26 }

// kernel: nstack2seq_decoder_layer_forward.14
= control target key start
LH: loop header
LB: loop body
LE: loop exit
PB: predicated region body
PF: predicated region fallthrough
CT: control target
= control target key end

     0   :  { %11 = vsyncpa [#allocation3], 0  ;;  %s1082_s0 = inlined_call_operand.vmem [shape: bf16[2,4,8,8], index: 0, kind: input, shape index: {}]   ;;  %s1083_s1 = inlined_call_operand.vmem [shape: bf16[2,2,4,10,8], index: 1, kind: input, shape index: {}, may-alias: {1,2}]   ;;  %s1084_s2 = inlined_call_operand.vmem [shape: bf16[2,2,4,10,8], index: 2, kind: input, shape index: {}, may-alias: {1,2}]   ;;  %s1085_s3 = inlined_call_operand.vmem [shape: f32[2,1,10], index: 3, kind: input, shape index: {}]   ;;  %s1086_s4 = inlined_call_operand.vmem [shape: bf16[2,4,8,8], index: 4, kind: output, shape index: {0}]   ;;  %s1087_s5 = inlined_call_operand.hbm [shape: f32[2,8,10], index: 5, kind: output, shape index: {1}]  }
   0x1   :  { %13 = vsyncpa [#allocation3 + $0x1], 0  ;;  %s928_s18 = smov 0   ;;  %s930_s19 = smov 0  }
   0x2   :  { %s932_s20 = smov 0   ;;  %s934_s21 = smov 0  }
   0x3   :  { %s936_s22 = smov 0   ;;  %s938_s23 = smov 0  }
   0x4   :  { %s940_s24 = smov 0   ;;  %s942_s25 = smov 0  }
   0x5 LB: > { %1091 = sst [smem:[#allocation5_spill]] %s891_s24  ;;  %s689_s26 = sadd.s32 4294967295, %s895_s25   ;;  %s895_s25 = sphi %s942_s25, %s19_s25   ;;  %s891_s24 = sphi %s940_s24, %s1099_s24   ;;  %s887_s23 = sphi %s938_s23, %s1104_s23   ;;  %s883_s22 = sphi %s936_s22, %s1097_s22   ;;  %s879_s21 = sphi %s934_s21, %s1103_s21   ;;  %s875_s20 = sphi %s932_s20, %s1102_s20   ;;  %s871_s19 = sphi %s930_s19, %s1101_s19   ;;  %s867_s18 = sphi %s928_s18, %s1100_s18  }
   0x6   : > { %s690_s27 = sadd.s32 4294967294, %s895_s25   ;;  %s31_s28 = sadd.s32 1, %s887_s23 }
   0x7   : > { %p32_p0 = scmp.ge.s32.totalorder %s31_s28, 4  ;;  %s38_s29 = sadd.s32 1, %s891_s24 }
   0x8   : > { %p199_p1 = scmp.ne.s32.totalorder %s875_s20, %s871_s19  ;;  %p200_p2 = scmp.eq.s32.totalorder %s689_s26, 7 }
   0x9   : > { %s1106_s28 = smov (%p32_p0, %s31_s28), 0  ;;  %s1108_s29 = smov (!%p32_p0, %s38_s29), %s891_s24 }
   0xa   : > { %1092 = sst [smem:[#allocation6_spill]] %s1106_s28  ;;  %p977_p3 = por %p200_p2, %p199_p1 }
   0xb   : > { %p205_p4 = scmp.ne.s32.totalorder %s871_s19, %s867_s18  ;;  %p40_p5 = scmp.ge.s32.totalorder %s1108_s29, 2 }
   0xc   : > { %p206_p6 = scmp.eq.s32.totalorder %s690_s27, 7  ;;  %p693_p7 = scmp.ge.s32.totalorder %s895_s25, 1 }
   0xd   : > { %p269_p8 = scmp.lt.s32.totalorder %s895_s25, 9  ;;  %s1110_s29 = smov (%p40_p5, %s1108_s29), 0 }
   0xe   : > { %1094 = sst [smem:[#allocation7_spill]] %s1110_s29  ;;  %p987_p9 = por %p206_p6, %p205_p4 }
   0xf   : > { %p270_p10 = pnand %p693_p7, %p269_p8  ;;  %s184_s7 = ssub.s32 %s891_s24, %s1110_s29 }
  0x10   : > { %s189_s8 = sadd.s32 1, %s875_s20  ;;  %p187_p11 = scmp.eq.s32.totalorder %s184_s7, 0 }
  0x11   : > { %273 = sbr.rel (%p270_p10) target bundleno = 585 (0x249), region = 36  ;;  %s1089_s10 = sand.u32 (!%p270_p10), 1, %s871_s19  }
  0x12   : > { %s995_s9 = scalar_select %p187_p11, %s875_s20, %s189_s8  }
  0x13   : > { %p336_p12 = scmp.lt.s32.totalorder (!%p270_p10), %s883_s22, 1  ;;  %s1001_s11 = sshll.u32 (!%p270_p10), %s1089_s10, 3 }
  0x14   : > { %p338_p13 = scmp.lt.s32.totalorder (!%p270_p10), %s879_s21, 3  ;;  %p717_p0 = scmp.ne.s32.totalorder (!%p270_p10), %s879_s21, 0 }
  0x16   : > { %s337_s12 = scalar_select %p336_p12, %s883_s22, 1  ;;  %vm393_vm0 = vcmask 64512   ;;  %vm413_vm1 = vcmask 80896   ;;  %vm449_vm2 = vcmask 1044480   ;;  %vm467_vm7 = vcmask 60416  }
  0x17   : > { %s339_s13 = scalar_select %p338_p13, %s879_s21, 3 }
  0x18   : > { %s698_s14 = sshll.u32 %s337_s12, 3  ;;  %s695_s16 = sshll.u32 %s337_s12, 2 }
  0x19   : > { %s697_s15 = sshll.u32 %s339_s13, 1  ;;  %s1012_s29 = sadd.s32 %s695_s16, %s339_s13 }
  0x1a   : > { %s1006_s17 = sadd.s32 %s698_s14, %s697_s15  ;;  %s368_s24 = scalar_lea.vmem %s1085_s3, %s337_s12 }
  0x1b   : > { %s699_s26 = sshll.u32 %s1006_s17, 2  ;;  %s696_s14 = sshll.u32 %s1012_s29, 2  ;;  %v796_v5 = vld [vmem:[%s368_s24] ss:$0 sm:$0xff] }
  0x1c   : > { %s355_s8 = scalar_lea.vmem %s1083_s1, %s699_s26  ;;  %s346_s27 = scalar_lea.vmem %s1082_s0, %s696_s14 }
  0x1d   : > { %v707_v0 = vld [vmem:[%s355_s8] sm:$0xf]  ;;  %v722_v1 = vld [vmem:[%s355_s8] sm:$0x10]  ;;  %s600_s12 = scalar_lea.vmem %s1084_s2, %s699_s26  ;;  %s379_s16 = scalar_lea.vmem %s1086_s4, %s696_s14 }
  0x1e   : > { %v708_v2 = vor.u32 %v722_v1, %v707_v0  ;;  %v381_v4 = vld [vmem:[%s346_s27] sm:$0xf]  ;;  %v723_v16 = vld [vmem:[%s600_s12 + $0x40] sm:$0x10]  ;;  %s335_s26 = scalar_lea.vmem [#allocation2], %s1001_s11 }
  0x1f   : > { %v714_v15 = vld [vmem:[%s600_s12 + $0x40] sm:$0xf] }
  0x20   : > { %v398_v3 = vsel %vm393_vm0, %v708_v2, 0  ;;  %v715_v17 = vor.u32 %v723_v16, %v714_v15 }
  0x21   : > { %407 = vmatpush.bf16.xpose.msra.mxu0 %v398_v3 }
  0x22   : > { %v451_v18 = vsel %vm449_vm2, %v715_v17, 0 }
  0x23   : > { %460 = vmatpush.bf16.msra.mxu1 %v451_v18 }
  0x28   : > { %709 = vmatmul.msk.bf16.vlgmr.msra.gmra.mxu0 %vm393_vm0, %v381_v4 }
  0xa5   : > { %v409_v6 = vpop.f32.mrf.mxu0 }
  0xa6   : > { %v410_v7 = vadd.f32 %v796_v5, %v409_v6 }
  0xa8   : > { %v414_v8 = vsel %vm413_vm1, %v410_v7, -inf }
  0xa9   : > { %415 = vmax.xlane.f32.xlu0 %v414_v8 }
  0xad   : > { %v411_v9 = vpop.f32.mrf.mxu0 }
 0x11c   : > { %v416_v10 = vpop.xlane.xlu0 %415 }
 0x11d   : > { %v417_v11 = vsub.f32 %v410_v7, %v416_v10 }
 0x11f   : > { %v418_v12 = vmul.f32 1.442695, %v417_v11 }
 0x121   : > { %797 = vpow2.f32 %v418_v12 }
 0x127   : > { %v798_v13 = vpop.eup %797 }
 0x128   : > { %v420_v14 = vsel %vm413_vm1, %v798_v13, 0.0 }
 0x129   : > { %421 = vadd.xlane.f32.xlu0 %v420_v14 }
 0x19c   : > { %v422_v19 = vpop.xlane.xlu0 %421 }
 0x19d   : > { %799 = vrcp.f32 %v422_v19  ;;  %v434_v23 = vand.u32 2147483648, %v422_v19  ;;  %v432_v25 = vand.u32 2147483647, %v422_v19  ;;  %vm428_vm4 = vweird.f32 %v422_v19 }
 0x19f   : > { %v435_v27 = vor.u32 1.1754944e-38, %v434_v23  ;;  %vm433_vm6 = vcmp.eq.f32.partialorder %v432_v25, 8.507059e+37 }
 0x1a3   : > { %v800_v20 = vpop.eup %799 }
 0x1a4   : > { %v424_v21 = vmul.f32 %v800_v20, %v422_v19  ;;  %vm429_vm3 = vweird.f32 %v800_v20 }
 0x1a5   : > { %vm430_vm5 = vmor %vm428_vm4, %vm429_vm3 }
 0x1a6   : > { %v425_v22 = vsub.f32 1.0, %v424_v21 }
 0x1a8   : > { %v426_v24 = vmul.f32 %v800_v20, %v425_v22 }
 0x1aa   : > { %v427_v26 = vadd.f32 %v800_v20, %v426_v24 }
 0x1ac   : > { %v431_v28 = vsel %vm430_vm5, %v800_v20, %v427_v26 }
 0x1ad   : > { %v436_v29 = vsel %vm433_vm6, %v435_v27, %v431_v28 }
 0x1ae   : > { %v437_v30 = vmul.f32 %v798_v13, %v436_v29 }
 0x1b0   : > { %v438_v31 = vpack.c.bf16 %v437_v30, %v437_v30 }
 0x1b2   : > { %716 = vmatmul.msk.bf16.vlgmr.msra.gmra.mxu1 %vm413_vm1, %v438_v31 }
 0x22f   : > { %v462_v32 = vpop.f32.mrf.mxu1 }
 0x230   : > { %v466_v33 = vpack.c.bf16 %v462_v32, %v462_v32 }
 0x232   : > { %468 = vst.msk [vmem:[%s379_s16] sm:$0xf] %vm467_vm7, %v466_v33 }
 0x233   : > { %472 = sbr.rel (%p717_p0) target bundleno = 570 (0x23a), region = 40 }
 0x237   : > { %v464_v34 = vpop.f32.mrf.mxu1 }
 0x238   : > { %v897_v35 = vmov 0.0  }
 0x239   : > { %473 = vst.msk [vmem:[%s335_s26] sm:$0xff] %vm413_vm1, %v897_v35 }
 0x23a PF: > { %v475_v37 = vmul.f32 0.25, %v437_v30  ;;  %s719_s29 = sshll.u32 %s883_s22, 3  ;;  %s506_s15 = sshll.u32 %s335_s26, 4  ;;  %s507_s15 = int_to_ptr.vmem [resolvable:$true] %s506_s15 }
 0x23b   : > { %s504_s14 = scalar_lea.hbm %s1087_s5, %s719_s29  ;;  %s1096_s21 = sand.u32 1, %s871_s19  }
 0x23c   : > { %s508_s11 = sshll.u32 %s504_s14, 4  ;;  %s490_s17 = scalar_lea.sflag [#allocation3], %s1096_s21  ;;  %s509_s11 = int_to_ptr.hbm [resolvable:$true] %s508_s11 }
 0x23d   : > { %s815_s27 = sshra.s32 %s509_s11, 4  ;;  %s821_s12 = scalar_lea.hbm %s1087_s5, 16  ;;  %s816_s27 = int_to_ptr.hbm [resolvable:$true] %s815_s27 }
 0x23e   : > { %s817_s28 = scalar_lea.hbm %s816_s27, 8  ;;  %p822_p5 = scmp.lt.s32.totalorder %s816_s27, %s1087_s5 }
 0x23f   : > { %p818_p1 = scmp.ne.s32.totalorder %s816_s27, %s817_s28  ;;  %p823_p6 = scmp.lt.s32.totalorder %s821_s12, %s817_s28 }
 0x240   : > { %v474_v36 = vld [vmem:[%s335_s26] sm:$0xff] }
 0x241   : > { %v476_v38 = vadd.f32 %v475_v37, %v474_v36  ;;  %p819_p2 = pnand %p818_p1, %p977_p3  ;;  %p824_p7 = por %p823_p6, %p822_p5 }
 0x243   : > { %477 = vst.msk [vmem:[%s335_s26] sm:$0xff] %vm413_vm1, %v476_v38  ;;  %p820_p4 = pneg %p819_p2 }
 0x245   : > { %p825_p8 = pnand %p824_p7, %p820_p4 }
 0x247   : > { %828 = shalt.err (!%p825_p8)
}
 0x248   : > { %724 = dma.vmem_to_hbm [thread:$0]  (%p977_p3), %s507_s15, 128, %s509_s11, %s490_s17  }
 0x249 PF: > { %p730_p10 = scmp.ge.s32.totalorder %s895_s25, 2  ;;  %s534_s16 = sand.u32 1, %s867_s18  }
 0x24a   : > { %s535_s26 = scalar_lea.sflag [#allocation3], %s534_s16 }
 0x24b   : > { %p727_p11 = pnand %p730_p10, %p987_p9 }
 0x24d   : > { %p728_p12 = pneg %p727_p11 }
 0x24f   : > { %862 = dma.done.wait (%p728_p12), %s535_s26, 128  }
 0x250   : > { %864 = vsyncadd (%p728_p12), %s535_s26, 4294967168  ;;  %s19_s25 = sadd.s32 1, %s895_s25   ;;  %s1097_s22 = sld [smem:[#allocation5_spill]] }
 0x251   : > { %p16_p13 = scmp.ge.s32.totalorder %s19_s25, 10   ;;  %s1098_s30 = sld [smem:[#allocation6_spill]] }
 0x252   : > { %s1099_s24 = sld [smem:[#allocation7_spill]]  ;;  %s1100_s18 = smov %s871_s19 }
 0x253   : > { %s1101_s19 = smov %s875_s20  ;;  %s1102_s20 = smov %s995_s9 }
 0x254   : > { %s1103_s21 = smov %s887_s23  ;;  %18 = sbr.rel (!%p16_p13) target bundleno = 5 (0x5), region = 96 }
 0x257   : > { %s1104_s23 = smov %s1098_s30 }
 0x259   :  { %541 = vsyncpa [#allocation3], 1 }
 0x25a   :  { %543 = vsyncpa [#allocation3 + $0x1], 1 }

// kernel: nstack2seq_decoder_layer_forward.16
= control target key start
LH: loop header
LB: loop body
LE: loop exit
PB: predicated region body
PF: predicated region fallthrough
CT: control target
= control target key end

     0   :  { %vm19_vm0 = vcmask 523264   ;;  %v110_v1 = vmov 0.0   ;;  %vm47_vm1 = vcmask 261120   ;;  %vm85_vm2 = vcmask 519168   ;;  %s153_s1 = inlined_call_operand.vmem [shape: bf16[32,64], index: 1, kind: input, shape index: {}]   ;;  %s154_s2 = inlined_call_operand.vmem [shape: f32[1,64], index: 2, kind: input, shape index: {}]   ;;  %s155_s0 = inlined_call_operand.vmem [shape: bf16[16,32], index: 0, kind: input, shape index: {}]   ;;  %s156_s3 = inlined_call_operand.vmem [shape: bf16[16,64], index: 3, kind: output, shape index: {}]  }
   0x1   :  { %v107_v0 = vld [vmem:[%s153_s1 + $0x8] sm:$0xff]  ;;  %20 = vst.msk [vmem:[#allocation2] sm:$0xff] %vm19_vm0, %v110_v1  ;;  %v106_v2 = vld [vmem:[%s153_s1] sm:$0xff] }
   0x2   :  { %21 = vst.msk [vmem:[#allocation2 + $0x8] sm:$0xff] %vm19_vm0, %v110_v1  ;;  %57 = vmatpush.bf16.msra.mxu0 %v107_v0  ;;  %v105_v3 = vld [vmem:[%s155_s0] sm:$0xff] }
   0x3   :  { %v109_v8 = vld [vmem:[%s154_s2] ss:$0 sm:$0xff] }
   0x6   :  { %58 = vmatpush.bf16.msra.mxu0 %v106_v2 }
   0x8   :  { %v22_v4 = vld [vmem:[#allocation2] sm:$0xff] }
   0x9   :  { %104 = vmatmul.msk.bf16.vlgmr.msra.gmra.mxu0 %vm47_vm1, %v105_v3  ;;  %v23_v7 = vld [vmem:[#allocation2 + $0x8] sm:$0xff] }
  0x86   :  { %v60_v5 = vpop.f32.mrf.mxu0 }
  0x87   :  { %v65_v6 = vadd.f32 %v60_v5, %v22_v4 }
  0x89   :  { %68 = vst.msk [vmem:[#allocation2] sm:$0xff] %vm19_vm0, %v65_v6 }
  0x8e   :  { %v62_v9 = vpop.f32.mrf.mxu0 }
  0x8f   :  { %v66_v10 = vadd.f32 %v62_v9, %v23_v7 }
  0x90   :  { %v73_v11 = vld [vmem:[#allocation2] sm:$0xff] }
  0x91   :  { %v79_v12 = vadd.f32 %v109_v8, %v73_v11  ;;  %69 = vst.msk [vmem:[#allocation2 + $0x8] sm:$0xff] %vm19_vm0, %v66_v10 }
  0x93   :  { %v81_v13 = vmax.f32 %v79_v12, 0.0 }
  0x95   :  { %v83_v14 = vpack.c.bf16 %v81_v13, %v81_v13 }
  0x97   :  { %86 = vst.msk [vmem:[%s156_s3] sm:$0xf] %vm85_vm2, %v83_v14 }
  0x98   :  { %v74_v15 = vld [vmem:[#allocation2 + $0x8] sm:$0xff] }
  0x99   :  { %v80_v16 = vadd.f32 %v109_v8, %v74_v15 }
  0x9b   :  { %v82_v17 = vmax.f32 %v80_v16, 0.0 }
  0x9d   :  { %v84_v18 = vpack.c.bf16 %v82_v17, %v82_v17 }
  0x9f   :  { %87 = vst.msk [vmem:[%s156_s3 + $0x4] sm:$0xf] %vm85_vm2, %v84_v18 }

// kernel: nstack2seq_decoder_layer_forward.17
= control target key start
LH: loop header
LB: loop body
LE: loop exit
PB: predicated region body
PF: predicated region fallthrough
CT: control target
= control target key end

     0   :  { %vm28_vm0 = vcmask 261120   ;;  %v222_v1 = vmov 0.0   ;;  %vm72_vm1 = vcmask 523264   ;;  %v223_v24 = vmov 32.0   ;;  %s302_s1 = inlined_call_operand.vmem [shape: bf16[64,32], index: 1, kind: input, shape index: {}]   ;;  %s303_s0 = inlined_call_operand.vmem [shape: bf16[16,64], index: 0, kind: input, shape index: {}]   ;;  %s304_s2 = inlined_call_operand.vmem [shape: f32[1,32], index: 2, kind: input, shape index: {}]   ;;  %s305_s3 = inlined_call_operand.vmem [shape: bf16[16,32], index: 3, kind: input, shape index: {}]   ;;  %s306_s4 = inlined_call_operand.vmem [shape: f32[1,32], index: 4, kind: input, shape index: {}]   ;;  %s307_s5 = inlined_call_operand.vmem [shape: f32[1,32], index: 5, kind: input, shape index: {}]   ;;  %s308_s6 = inlined_call_operand.vmem [shape: f32[16,32], index: 6, kind: output, shape index: {}]  }
   0x1   :  { %v206_v0 = vld [vmem:[%s302_s1 + $0x18] sm:$0xff]  ;;  %29 = vst.msk [vmem:[#allocation2] sm:$0xff] %vm28_vm0, %v222_v1  ;;  %v205_v2 = vld [vmem:[%s302_s1 + $0x10] sm:$0xff]  ;;  %v204_v3 = vld [vmem:[%s302_s1 + $0x8] sm:$0xff]  ;;  %216 = vrcp.f32 %v223_v24 }
   0x2   :  { %30 = vst.msk [vmem:[#allocation2 + $0x8] sm:$0xff] %vm28_vm0, %v222_v1  ;;  %80 = vmatpush.bf16.msra.mxu0 %v206_v0  ;;  %v203_v4 = vld [vmem:[%s302_s1] sm:$0xff] }
   0x3   :  { %v202_v5 = vld [vmem:[%s303_s0] sm:$0xff] }
   0x4   :  { %v208_v10 = vld [vmem:[%s305_s3] sm:$0xff]  }
   0x5   :  { %v213_v11 = vld [vmem:[%s304_s2] ss:$0 sm:$0xff]  ;;  %v209_v14 = vunpack.c.l.bf16 %v208_v10  ;;  %v210_v19 = vunpack.c.h.bf16 %v208_v10 }
   0x6   :  { %81 = vmatpush.bf16.msra.mxu0 %v205_v2  ;;  %v214_v55 = vld [vmem:[%s306_s4] ss:$0 sm:$0xff] }
   0x7   :  { %v217_v25 = vpop.eup %216  ;;  %v215_v58 = vld [vmem:[%s307_s5] ss:$0 sm:$0xff] }
   0x8   :  { %v31_v6 = vld [vmem:[#allocation2] sm:$0xff]  ;;  %v119_v26 = vmul.f32 32.0, %v217_v25  ;;  %vm123_vm2 = vweird.f32 %v217_v25 }
   0x9   :  { %v32_v9 = vld [vmem:[#allocation2 + $0x8] sm:$0xff] }
   0xa   :  { %82 = vmatpush.bf16.msra.mxu0 %v204_v3  ;;  %v120_v27 = vsub.f32 1.0, %v119_v26 }
   0xc   :  { %v121_v28 = vmul.f32 %v217_v25, %v120_v27 }
   0xe   :  { %83 = vmatpush.bf16.msra.mxu0 %v203_v4  ;;  %v122_v29 = vadd.f32 %v217_v25, %v121_v28 }
  0x10   :  { %v124_v30 = vsel %vm123_vm2, %v217_v25, %v122_v29 }
  0x11   :  { %201 = vmatmul.msk.bf16.vlgmr.msra.gmra.mxu0 %vm72_vm1, %v202_v5 }
  0x8e   :  { %v85_v7 = vpop.f32.mrf.mxu0 }
  0x8f   :  { %v90_v8 = vadd.f32 %v85_v7, %v31_v6 }
  0x91   :  { %93 = vst.msk [vmem:[#allocation2] sm:$0xff] %vm28_vm0, %v90_v8 }
  0x96   :  { %v87_v12 = vpop.f32.mrf.mxu0 }
  0x97   :  { %v91_v13 = vadd.f32 %v87_v12, %v32_v9 }
  0x98   :  { %v98_v15 = vld [vmem:[#allocation2] sm:$0xff] }
  0x99   :  { %94 = vst.msk [vmem:[#allocation2 + $0x8] sm:$0xff] %vm28_vm0, %v91_v13  ;;  %v104_v16 = vadd.f32 %v213_v11, %v98_v15 }
  0x9b   :  { %v110_v17 = vadd.f32 %v209_v14, %v104_v16 }
  0x9d   :  { %v112_v18 = vsel %vm28_vm0, %v110_v17, 0.0 }
  0x9e   :  { %113 = vadd.xlane.f32.xlu0 %v112_v18 }
  0xa0   :  { %v99_v20 = vld [vmem:[#allocation2 + $0x8] sm:$0xff] }
  0xa1   :  { %v105_v21 = vadd.f32 %v213_v11, %v99_v20 }
  0xa3   :  { %v111_v22 = vadd.f32 %v210_v19, %v105_v21 }
  0xa5   :  { %v115_v23 = vsel %vm28_vm0, %v111_v22, 0.0 }
  0xa6   :  { %116 = vadd.xlane.f32.xlu0 %v115_v23 }
 0x111   :  { %v114_v31 = vpop.xlane.xlu0 %113 }
 0x112   :  { %v125_v32 = vmul.f32 %v124_v30, %v114_v31 }
 0x114   :  { %v127_v33 = vsub.f32 %v110_v17, %v125_v32 }
 0x116   :  { %v129_v34 = vmul.f32 %v127_v33, %v127_v33 }
 0x118   :  { %v131_v35 = vsel %vm28_vm0, %v129_v34, 0.0 }
 0x119   :  { %132 = vadd.xlane.f32.xlu1 %v131_v35  ;;  %v117_v36 = vpop.xlane.xlu0 %116 }
 0x11a   :  { %v126_v37 = vmul.f32 %v124_v30, %v117_v36 }
 0x11c   :  { %v128_v38 = vsub.f32 %v111_v22, %v126_v37 }
 0x11e   :  { %v130_v39 = vmul.f32 %v128_v38, %v128_v38 }
 0x120   :  { %v134_v40 = vsel %vm28_vm0, %v130_v39, 0.0 }
 0x121   :  { %135 = vadd.xlane.f32.xlu1 %v134_v40 }
 0x18c   :  { %v133_v41 = vpop.xlane.xlu1 %132 }
 0x18d   :  { %v137_v42 = vmul.f32 %v133_v41, %v124_v30 }
 0x18f   :  { %v139_v43 = vadd.f32 1e-05, %v137_v42 }
 0x191   :  { %218 = vrsqrt.f32 %v139_v43  ;;  %vm147_vm4 = vweird.f32 %v139_v43 }
 0x194   :  { %v136_v44 = vpop.xlane.xlu1 %135 }
 0x195   :  { %v138_v45 = vmul.f32 %v136_v44, %v124_v30 }
 0x197   :  { %v219_v46 = vpop.eup %218  ;;  %v140_v47 = vadd.f32 1e-05, %v138_v45 }
 0x198   :  { %v142_v48 = vmul.f32 %v219_v46, %v139_v43  ;;  %vm148_vm3 = vweird.f32 %v219_v46 }
 0x199   :  { %220 = vrsqrt.f32 %v140_v47  ;;  %vm149_vm5 = vmor %vm147_vm4, %vm148_vm3  ;;  %vm157_vm7 = vweird.f32 %v140_v47 }
 0x19a   :  { %v143_v49 = vmul.f32 %v219_v46, %v142_v48 }
 0x19c   :  { %v144_v50 = vmul.f32 0.5, %v143_v49 }
 0x19e   :  { %v145_v51 = vsub.f32 1.5, %v144_v50 }
 0x19f   :  { %v221_v52 = vpop.eup %220 }
 0x1a0   :  { %v146_v53 = vmul.f32 %v219_v46, %v145_v51  ;;  %v152_v54 = vmul.f32 %v221_v52, %v140_v47  ;;  %vm158_vm6 = vweird.f32 %v221_v52 }
 0x1a1   :  { %vm159_vm8 = vmor %vm157_vm7, %vm158_vm6 }
 0x1a2   :  { %v150_v56 = vsel %vm149_vm5, %v219_v46, %v146_v53  ;;  %v153_v57 = vmul.f32 %v221_v52, %v152_v54 }
 0x1a3   :  { %v161_v59 = vmul.f32 %v150_v56, %v127_v33 }
 0x1a4   :  { %v154_v60 = vmul.f32 0.5, %v153_v57 }
 0x1a5   :  { %v167_v61 = vmul.f32 %v214_v55, %v161_v59 }
 0x1a6   :  { %v155_v62 = vsub.f32 1.5, %v154_v60 }
 0x1a7   :  { %v173_v63 = vadd.f32 %v215_v58, %v167_v61 }
 0x1a8   :  { %v156_v0 = vmul.f32 %v221_v52, %v155_v62 }
 0x1a9   :  { %175 = vst.msk [vmem:[%s308_s6] sm:$0xff] %vm28_vm0, %v173_v63 }
 0x1aa   :  { %v160_v1 = vsel %vm159_vm8, %v221_v52, %v156_v0 }
 0x1ab   :  { %v162_v2 = vmul.f32 %v160_v1, %v128_v38 }
 0x1ad   :  { %v168_v3 = vmul.f32 %v214_v55, %v162_v2 }
 0x1af   :  { %v174_v4 = vadd.f32 %v215_v58, %v168_v3 }
 0x1b1   :  { %176 = vst.msk [vmem:[%s308_s6 + $0x8] sm:$0xff] %vm28_vm0, %v174_v4 }

</bundles_post_ra>
